<compile_context>
chip_gen: v7x
topology: tpu7x:2x2x1
jax: 0.10.0
libtpu: 0.0.40
codegen_flags: <defaults>
</compile_context>

<pallas_src>
import functools
import math

import jax
import jax.numpy as jnp
from jax.experimental import pallas as pl
from jax.experimental.pallas import tpu as pltpu


# --------------------------------------------------------------- helpers ----

def _round_up(x: int, m: int) -> int:
    return ((x + m - 1) // m) * m


@functools.lru_cache(maxsize=None)
def _vmem_limit_bytes() -> int:
    # ~0.75x of the chip's physical VMEM (v5e/v6e: 128 MiB -> 96 MiB,
    # v7x: 64 MiB -> 48 MiB); leaves headroom for semaphores/compiler scratch.
    cap = 0
    try:
        cap = int(getattr(pltpu.get_tpu_info(), "vmem_capacity_bytes", 0) or 0)
    except Exception:
        cap = 0
    if cap <= 0:
        cap = 64 * 1024 * 1024
    return int(cap * 3 // 4)


def _mosaic_params() -> pltpu.CompilerParams:
    # Every grid here is 1-D with fully independent steps.
    return pltpu.CompilerParams(dimension_semantics=("parallel",),
                                vmem_limit_bytes=_vmem_limit_bytes())


def _pick_row_tile(m: int, row_align: int, desired: int = 512):
    """Row tile for the row-tiled kernels.

    * dtype-aware alignment (8 rows f32, 16 rows bf16 sublane packing),
    * large tiles (up to 512) so memory-bound paths sit near the HBM roofline,
    * keep the 1-D "parallel" grid >= 2 steps when possible (v7x has 2 TCs).
    """
    m_aligned = _round_up(m, row_align)
    tm = min(desired, m_aligned)
    if _round_up(m, tm) == tm:               # would collapse to one grid step
        half = tm // 2
        if half >= row_align and half % row_align == 0:
            tm = half
    m_pad = _round_up(m, tm)
    return tm, m_pad


def _fast_recip(x):
    # EUP approximate reciprocal (separate VLIW slot -> effectively free) plus
    # one Newton-Raphson step to restore full f32 accuracy.
    r = pl.reciprocal(x, approx=True)
    return r * (2.0 - x * r)


def _residual_norm_f32(y, res, alpha, beta, eps):
    """ResidualNorm epilogue: alpha*(v-mean)/(std+eps)+beta with v = y + res.

    `y` must already be f32. torch's x.std() is the unbiased (N-1) estimator.
    The dropout applied after the norm is identity in eval mode.
    """
    v = y + res.astype(jnp.float32)
    d = v.shape[-1]
    mean = jnp.mean(v, axis=-1, keepdims=True)
    c = v - mean
    std = jnp.sqrt(jnp.sum(c * c, axis=-1, keepdims=True) * (1.0 / (d - 1)))
    return (alpha.astype(jnp.float32) * c * _fast_recip(std + eps)
            + beta.astype(jnp.float32))


# --------------------------------------------------------------- kernels ----

def _input_proj_kernel(x_ref, w_ref, b_ref, pe_ref, o_ref):
    # en_input Linear fused with the positional-encoding add; the PE block is
    # the same (S, d) table for every batch (never broadcast in HBM).
    y = jnp.dot(x_ref[...], w_ref[...], preferred_element_type=jnp.float32)
    y = y + b_ref[...].astype(jnp.float32) + pe_ref[...].astype(jnp.float32)
    o_ref[...] = y.astype(o_ref.dtype)


def _qkv_kernel(x_ref, w_ref, b_ref, o_ref):
    y = jnp.dot(x_ref[...], w_ref[...], preferred_element_type=jnp.float32)
    o_ref[...] = (y + b_ref[...].astype(jnp.float32)).astype(o_ref.dtype)


def _attn_block_kernel(qkv_ref, wo_ref, bo_ref, res_ref, alpha_ref, beta_ref,
                       o_ref, *, heads, dk, scale, eps):
    # One batch per grid step.  Heads are static column slices of the (S, 3d)
    # QKV block; attention-out projection and residual+norm are fused as the
    # epilogue, so the only store is one lane-dense (S, d) block.
    d = heads * dk
    qkv = qkv_ref[...]
    per_head = []
    for h in range(heads):                 # static unroll; heads is small
        # TODO(synk): pack heads for deeper MXU contraction at transformer scale.
        q = qkv[:, h * dk:(h + 1) * dk]
        k = qkv[:, d + h * dk:d + (h + 1) * dk]
        v = qkv[:, 2 * d + h * dk:2 * d + (h + 1) * dk]
        s = jax.lax.dot_general(q, k, (((1,), (1,)), ((), ())),
                                preferred_element_type=jnp.float32) * scale
        # TODO(synk): masked_fill path when an attention mask is supplied.
        s_max = jnp.max(s, axis=-1, keepdims=True)
        p = jnp.exp(s - s_max)
        w = p * _fast_recip(jnp.sum(p, axis=-1, keepdims=True))
        # attention dropout == identity (eval mode)
        per_head.append(jnp.dot(w.astype(v.dtype), v,
                                preferred_element_type=jnp.float32))
    concat = jnp.concatenate(per_head, axis=-1)             # (S, d), f32
    y = (jnp.dot(concat.astype(wo_ref.dtype), wo_ref[...],
                 preferred_element_type=jnp.float32)
         + bo_ref[...].astype(jnp.float32))
    o_ref[...] = _residual_norm_f32(y, res_ref[...], alpha_ref[...],
                                    beta_ref[...], eps).astype(o_ref.dtype)


def _ffn_norm_kernel(x_ref, w1_ref, b1_ref, w2_ref, b2_ref,
                     alpha_ref, beta_ref, o_ref, *, eps):
    # FeedForward (Linear -> ReLU -> [dropout: identity] -> Linear) fused with
    # residual + ResidualNorm; the residual is the FFN input itself.
    x = x_ref[...]
    h = jnp.dot(x, w1_ref[...], preferred_element_type=jnp.float32)
    h = jnp.maximum(h + b1_ref[...].astype(jnp.float32), 0.0)
    y = (jnp.dot(h.astype(w2_ref.dtype), w2_ref[...],
                 preferred_element_type=jnp.float32)
         + b2_ref[...].astype(jnp.float32))
    o_ref[...] = _residual_norm_f32(y, x, alpha_ref[...], beta_ref[...],
                                    eps).astype(o_ref.dtype)


# -------------------------------------------------------------- wrappers ----

def _input_projection(x2, w, bvec, pe, *, batch, seq):
    m, src = x2.shape
    d = w.shape[1]
    itemsize = jnp.dtype(x2.dtype).itemsize
    return pl.pallas_call(
        _input_proj_kernel,
        out_shape=jax.ShapeDtypeStruct((m, d), x2.dtype),
        grid_spec=pltpu.PrefetchScalarGridSpec(
            num_scalar_prefetch=0, grid=(batch,),
            in_specs=[
                pl.BlockSpec((seq, src), lambda i: (i, 0)),
                pl.BlockSpec((src, d), lambda i: (0, 0)),
                pl.BlockSpec((1, d), lambda i: (0, 0)),
                pl.BlockSpec((seq, d), lambda i: (0, 0)),   # PE table (shared)
            ],
            out_specs=pl.BlockSpec((seq, d), lambda i: (i, 0)),
        ),
        compiler_params=_mosaic_params(),
        cost_estimate=pl.CostEstimate(
            flops=2 * m * src * d, transcendentals=0,
            bytes_accessed=(m * src + src * d + d + seq * d + m * d) * itemsize),
    )(x2, w, bvec.reshape(1, d), pe)


def _qkv_linear(x2, w, bvec, *, tm):
    m, k = x2.shape
    n = w.shape[1]
    itemsize = jnp.dtype(x2.dtype).itemsize
    return pl.pallas_call(
        _qkv_kernel,
        out_shape=jax.ShapeDtypeStruct((m, n), x2.dtype),
        grid_spec=pltpu.PrefetchScalarGridSpec(
            num_scalar_prefetch=0, grid=(m // tm,),
            in_specs=[
                pl.BlockSpec((tm, k), lambda i: (i, 0)),    # activation tile
                # TODO(synk): mark constant weight/bias blocks single-buffered
                # (pipeline_mode=pl.Buffered(1)) once validated on target jax.
                pl.BlockSpec((k, n), lambda i: (0, 0)),     # W (resident)
                pl.BlockSpec((1, n), lambda i: (0, 0)),     # bias
            ],
            out_specs=pl.BlockSpec((tm, n), lambda i: (i, 0)),
        ),
        compiler_params=_mosaic_params(),
        cost_estimate=pl.CostEstimate(
            flops=2 * m * k * n, transcendentals=0,
            bytes_accessed=(m * k + k * n + n + m * n) * itemsize),
    )(x2, w, bvec.reshape(1, n))


def _attention_block(qkv, resid, w_out, b_out, alpha, beta, *,
                     batch, seq, heads, dk, eps):
    rows = qkv.shape[0]
    d = heads * dk
    itemsize = jnp.dtype(qkv.dtype).itemsize
    kernel = functools.partial(_attn_block_kernel, heads=heads, dk=dk,
                               scale=1.0 / math.sqrt(dk), eps=eps)
    # TODO(synk): for long sequences add a KV "arbitrary" grid axis with online
    # softmax so the per-step f32 scores stay within v7x's 64 MiB VMEM.
    return pl.pallas_call(
        kernel,
        out_shape=jax.ShapeDtypeStruct((rows, d), qkv.dtype),
        grid_spec=pltpu.PrefetchScalarGridSpec(
            num_scalar_prefetch=0, grid=(batch,),
            in_specs=[
                pl.BlockSpec((seq, 3 * d), lambda i: (i, 0)),  # QKV rows of batch i
                pl.BlockSpec((d, d), lambda i: (0, 0)),        # W_out (resident)
                pl.BlockSpec((1, d), lambda i: (0, 0)),        # b_out
                pl.BlockSpec((seq, d), lambda i: (i, 0)),      # residual (layer in)
                pl.BlockSpec((1, d), lambda i: (0, 0)),        # alpha
                pl.BlockSpec((1, d), lambda i: (0, 0)),        # beta
            ],
            out_specs=pl.BlockSpec((seq, d), lambda i: (i, 0)),
        ),
        compiler_params=_mosaic_params(),
        cost_estimate=pl.CostEstimate(
            flops=batch * (4 * seq * seq * d + 2 * seq * d * d),
            transcendentals=batch * heads * seq * seq,
            bytes_accessed=(batch * seq * (3 * d + 2 * d) + d * d + 4 * d) * itemsize),
    )(qkv, w_out, b_out.reshape(1, d), resid,
      alpha.reshape(1, d), beta.reshape(1, d))


def _ffn_norm(x2, w1, b1, w2, b2, alpha, beta, *, eps, tm):
    m, d = x2.shape
    f = w1.shape[1]
    itemsize = jnp.dtype(x2.dtype).itemsize
    # TODO(synk): for transformer-scale d_ff, add a d_ff "arbitrary" grid axis
    # with an f32 VMEM accumulator instead of keeping both weights resident.
    return pl.pallas_call(
        functools.partial(_ffn_norm_kernel, eps=eps),
        out_shape=jax.ShapeDtypeStruct((m, d), x2.dtype),
        grid_spec=pltpu.PrefetchScalarGridSpec(
            num_scalar_prefetch=0, grid=(m // tm,),
            in_specs=[
                pl.BlockSpec((tm, d), lambda i: (i, 0)),   # x tile (also residual)
                pl.BlockSpec((d, f), lambda i: (0, 0)),    # W1 (resident)
                pl.BlockSpec((1, f), lambda i: (0, 0)),    # b1
                pl.BlockSpec((f, d), lambda i: (0, 0)),    # W2 (resident)
                pl.BlockSpec((1, d), lambda i: (0, 0)),    # b2
                pl.BlockSpec((1, d), lambda i: (0, 0)),    # alpha
                pl.BlockSpec((1, d), lambda i: (0, 0)),    # beta
            ],
            out_specs=pl.BlockSpec((tm, d), lambda i: (i, 0)),
        ),
        compiler_params=_mosaic_params(),
        cost_estimate=pl.CostEstimate(
            flops=4 * m * d * f, transcendentals=0,
            bytes_accessed=(2 * m * d + 2 * d * f + f + 3 * d) * itemsize),
    )(x2, w1, b1.reshape(1, f), w2, b2.reshape(1, d),
      alpha.reshape(1, d), beta.reshape(1, d))


@functools.partial(jax.jit, static_argnames=("heads", "eps"))
def encoder_forward(x, params, *, heads, eps):
    """Eval-mode forward pass of the PyTorch Encoder (dropout == identity)."""
    b, s, src = x.shape
    d = params["w_in"].shape[1]
    dk = d // heads
    m = b * s
    if s % 8 != 0:
        # TODO(synk): pad/mask the sequence axis for non-multiple-of-8 seq_len.
        raise NotImplementedError("seq_len must be a multiple of 8")

    row_align = 16 if x.dtype == jnp.bfloat16 else 8
    tm, m_pad = _pick_row_tile(m, row_align)

    # en_input Linear + positional-encoding add (grid over batch).
    h = _input_projection(x.reshape(m, src), params["w_in"], params["b_in"],
                          params["pe"][:s].astype(x.dtype), batch=b, seq=s)
    if m_pad != m:
        # Single pad for the whole network; padded rows never mix with real
        # rows (attention only ever reads the first b*s rows).
        h = jnp.pad(h, ((0, m_pad - m), (0, 0)))

    for layer in params["layers"]:
        # fused QKV projection
        qkv = _qkv_linear(h, layer["w_qkv"], layer["b_qkv"], tm=tm)
        # attention + out-projection + residual + norm1 (per-batch grid)
        n1 = _attention_block(qkv, h, layer["w_out"], layer["b_out"],
                              layer["alpha1"], layer["beta1"],
                              batch=b, seq=s, heads=heads, dk=dk, eps=eps)
        # FFN + residual + norm2
        h = _ffn_norm(n1, layer["w1"], layer["b1"], layer["w2"], layer["b2"],
                      layer["alpha2"], layer["beta2"], eps=eps, tm=tm)

    h = h[:m] if m_pad != m else h
    return h.reshape(b, s, d)


# ---------------------------------------------------------- params / ref ----

def make_positional_encoding(max_seq_len, d_model):
    pos = jnp.arange(max_seq_len, dtype=jnp.float32)[:, None]
    two_i = jnp.arange(0, d_model, 2, dtype=jnp.float32)
    div_term = jnp.power(10000.0, two_i / d_model)
    pe = jnp.zeros((max_seq_len, d_model), jnp.float32)
    pe = pe.at[:, 0::2].set(jnp.sin(pos / div_term))
    pe = pe.at[:, 1::2].set(jnp.cos(pos / div_term))
    return pe


def init_encoder_params(key, *, src_size, d_model, heads, num_layers,
                        d_ff=128, max_seq_len=200, dtype=jnp.float32):
    """nn.Linear-style init (uniform +-1/sqrt(fan_in)); weights stored (in, out)."""
    def linear_init(k, fan_in, fan_out):
        kw, kb = jax.random.split(k)
        bound = 1.0 / math.sqrt(fan_in)
        w = jax.random.uniform(kw, (fan_in, fan_out), dtype, -bound, bound)
        bb = jax.random.uniform(kb, (fan_out,), dtype, -bound, bound)
        return w, bb

    keys = jax.random.split(key, num_layers + 1)
    w_in, b_in = linear_init(keys[0], src_size, d_model)
    layers = []
    for li in range(num_layers):
        lk = jax.random.split(keys[li + 1], 6)
        wq, bq = linear_init(lk[0], d_model, d_model)
        wk, bk = linear_init(lk[1], d_model, d_model)
        wv, bv = linear_init(lk[2], d_model, d_model)
        wo, bo = linear_init(lk[3], d_model, d_model)
        w1, b1 = linear_init(lk[4], d_model, d_ff)
        w2, b2 = linear_init(lk[5], d_ff, d_model)
        layers.append(dict(
            w_qkv=jnp.concatenate([wq, wk, wv], axis=1),
            b_qkv=jnp.concatenate([bq, bk, bv]),
            w_out=wo, b_out=bo,
            w1=w1, b1=b1, w2=w2, b2=b2,
            alpha1=jnp.ones((d_model,), dtype), beta1=jnp.zeros((d_model,), dtype),
            alpha2=jnp.ones((d_model,), dtype), beta2=jnp.zeros((d_model,), dtype)))
    return dict(w_in=w_in, b_in=b_in,
                pe=make_positional_encoding(max_seq_len, d_model).astype(dtype),
                layers=layers)


def _residual_norm_ref(x, res, alpha, beta, eps):
    v = x + res
    mean = v.mean(axis=-1, keepdims=True)
    std = jnp.std(v, axis=-1, keepdims=True, ddof=1)   # torch unbiased std
    return alpha * (v - mean) / (std + eps) + beta


def encoder_reference(x, params, *, heads, eps):
    """Pure-JAX f32 reference (highest matmul precision), eval mode."""
    hi = jax.lax.Precision.HIGHEST
    b, s, _ = x.shape
    d = params["w_in"].shape[1]
    dk = d // heads
    h = jnp.einsum("bsf,fd->bsd", x, params["w_in"], precision=hi) + params["b_in"]
    h = h + params["pe"][:s][None]
    for layer in params["layers"]:
        qkv = jnp.einsum("bsd,de->bse", h, layer["w_qkv"], precision=hi) + layer["b_qkv"]
        q, k, v = jnp.split(qkv, 3, axis=-1)
        sh = lambda t: t.reshape(b, s, heads, dk).transpose(0, 2, 1, 3)
        q, k, v = sh(q), sh(k), sh(v)
        scores = jnp.einsum("bhqd,bhkd->bhqk", q, k, precision=hi) / math.sqrt(dk)
        w = jax.nn.softmax(scores, axis=-1)
        attn = jnp.einsum("bhqk,bhkd->bhqd", w, v, precision=hi)
        concat = attn.transpose(0, 2, 1, 3).reshape(b, s, d)
        score = jnp.einsum("bsd,de->bse", concat, layer["w_out"], precision=hi) + layer["b_out"]
        n1 = _residual_norm_ref(score, h, layer["alpha1"], layer["beta1"], eps)
        hid = jnp.maximum(
            jnp.einsum("bsd,df->bsf", n1, layer["w1"], precision=hi) + layer["b1"], 0.0)
        ff = jnp.einsum("bsf,fd->bsd", hid, layer["w2"], precision=hi) + layer["b2"]
        h = _residual_norm_ref(ff, n1, layer["alpha2"], layer["beta2"], eps)
    return h


if __name__ == "__main__":
    key = jax.random.PRNGKey(0)
    k_params, k_x = jax.random.split(key)

    # Small but lane-dense shapes (d_model multiple of 128).
    batch, seq = 2, 8
    src_size, d_model, heads, num_layers, d_ff, dropout = 16, 128, 8, 2, 128, 0.2
    # NOTE: the PyTorch EncoderLayer passes `dropout` into ResidualNorm's eps
    # slot (positional-argument quirk), so the effective norm eps is 0.2.
    norm_eps = dropout

    params = init_encoder_params(k_params, src_size=src_size, d_model=d_model,
                                 heads=heads, num_layers=num_layers, d_ff=d_ff)
    x = jax.random.normal(k_x, (batch, seq, src_size), jnp.float32)

    out = jax.block_until_ready(
        encoder_forward(x, params, heads=heads, eps=norm_eps))
    assert out.shape == (batch, seq, d_model)

    ref = encoder_reference(x, params, heads=heads, eps=norm_eps)
    max_err = float(jnp.max(jnp.abs(out - ref)))
    assert jnp.allclose(out, ref, atol=1e-3, rtol=1e-3), f"f32 mismatch: {max_err}"

    # bfloat16 path: bf16 MXU inputs with f32 accumulation.
    cast = lambda a: a.astype(jnp.bfloat16) if a.dtype == jnp.float32 else a
    params_bf16 = jax.tree_util.tree_map(cast, params)
    out_bf16 = jax.block_until_ready(
        encoder_forward(x.astype(jnp.bfloat16), params_bf16,
                        heads=heads, eps=norm_eps))
    assert out_bf16.shape == (batch, seq, d_model)
    bf16_err = float(jnp.max(jnp.abs(out_bf16.astype(jnp.float32) - ref)))
    assert bf16_err < 0.5, f"bf16 sanity bound exceeded: {bf16_err}"

    print("KERNEL_OK")
</pallas_src>

<mosaic_0001>
module attributes {stable_mosaic.version = 11 : i64} {
  func.func @_input_proj_kernel(%arg0: i32, %arg1: memref<8x16xf32, #tpu.memory_space<vmem>>, %arg2: memref<16x128xf32, #tpu.memory_space<vmem>>, %arg3: memref<1x128xf32, #tpu.memory_space<vmem>>, %arg4: memref<8x128xf32, #tpu.memory_space<vmem>>, %arg5: memref<8x128xf32, #tpu.memory_space<vmem>>) attributes {dimension_semantics = [#tpu.dimension_semantics<parallel>], iteration_bounds = array<i64: 2>, scalar_prefetch = 0 : i64, scratch_operands = 0 : i64, tpu.core_type = #tpu.core_type<tc>, window_params = [{transform_indices = @transform_0, window_bounds = array<i64: 8, 16>}, {pipeline_mode = #tpu.pipeline_mode<synchronous>, transform_indices = @transform_1, window_bounds = array<i64: 16, 128>}, {pipeline_mode = #tpu.pipeline_mode<synchronous>, transform_indices = @transform_2, window_bounds = array<i64: 1, 128>}, {pipeline_mode = #tpu.pipeline_mode<synchronous>, transform_indices = @transform_3, window_bounds = array<i64: 8, 128>}, {transform_indices = @transform_4, window_bounds = array<i64: 8, 128>}]} {
    %c0 = arith.constant 0 : index
    %c0_0 = arith.constant 0 : index
    %0 = vector.load %arg1[%c0, %c0_0] : memref<8x16xf32, #tpu.memory_space<vmem>>, vector<8x16xf32>
    %c0_1 = arith.constant 0 : index
    %c0_2 = arith.constant 0 : index
    %1 = vector.load %arg2[%c0_1, %c0_2] : memref<16x128xf32, #tpu.memory_space<vmem>>, vector<16x128xf32>
    %cst = arith.constant dense<0.000000e+00> : vector<8x128xf32>
    %2 = tpu.matmul %0, %1, %cst {dimension_numbers = #tpu.dot_dimension_numbers<[1], [0], [0], [1], [0, 0, 1, 1], [], []>} : vector<8x16xf32>, vector<16x128xf32>, vector<8x128xf32> -> vector<8x128xf32>
    %c0_3 = arith.constant 0 : index
    %c0_4 = arith.constant 0 : index
    %3 = vector.load %arg3[%c0_3, %c0_4] : memref<1x128xf32, #tpu.memory_space<vmem>>, vector<1x128xf32>
    %4 = vector.broadcast %3 : vector<1x128xf32> to vector<8x128xf32>
    %5 = arith.addf %2, %4 : vector<8x128xf32>
    %c0_5 = arith.constant 0 : index
    %c0_6 = arith.constant 0 : index
    %6 = vector.load %arg4[%c0_5, %c0_6] : memref<8x128xf32, #tpu.memory_space<vmem>>, vector<8x128xf32>
    %7 = arith.addf %5, %6 : vector<8x128xf32>
    %c0_7 = arith.constant 0 : index
    %c0_8 = arith.constant 0 : index
    %8 = vector.load %arg5[%c0_7, %c0_8] : memref<8x128xf32, #tpu.memory_space<vmem>>, vector<8x128xf32>
    tpu.vector_store %arg5[%c0_7, %c0_8], %7 {strides = array<i32>} : memref<8x128xf32, #tpu.memory_space<vmem>>, vector<8x128xf32>,
    return
  }
  func.func @transform_0(%arg0: i32) -> (i32, i32) {
    %c0_i32 = arith.constant 0 : i32
    %c0_i32_0 = arith.constant 0 : i32
    return %arg0, %c0_i32 : i32, i32
  }
  func.func @transform_1(%arg0: i32) -> (i32, i32) {
    %c0_i32 = arith.constant 0 : i32
    %c0_i32_0 = arith.constant 0 : i32
    %c0_i32_1 = arith.constant 0 : i32
    return %c0_i32, %c0_i32_0 : i32, i32
  }
  func.func @transform_2(%arg0: i32) -> (i32, i32) {
    %c0_i32 = arith.constant 0 : i32
    %c0_i32_0 = arith.constant 0 : i32
    %c0_i32_1 = arith.constant 0 : i32
    return %c0_i32, %c0_i32_0 : i32, i32
  }
  func.func @transform_3(%arg0: i32) -> (i32, i32) {
    %c0_i32 = arith.constant 0 : i32
    %c0_i32_0 = arith.constant 0 : i32
    %c0_i32_1 = arith.constant 0 : i32
    return %c0_i32, %c0_i32_0 : i32, i32
  }
  func.func @transform_4(%arg0: i32) -> (i32, i32) {
    %c0_i32 = arith.constant 0 : i32
    %c0_i32_0 = arith.constant 0 : i32
    return %arg0, %c0_i32 : i32, i32
  }
}

module attributes {stable_mosaic.version = 11 : i64} {
  func.func @_qkv_kernel(%arg0: i32, %arg1: memref<8x128xf32, #tpu.memory_space<vmem>>, %arg2: memref<128x384xf32, #tpu.memory_space<vmem>>, %arg3: memref<1x384xf32, #tpu.memory_space<vmem>>, %arg4: memref<8x384xf32, #tpu.memory_space<vmem>>) attributes {dimension_semantics = [#tpu.dimension_semantics<parallel>], iteration_bounds = array<i64: 2>, scalar_prefetch = 0 : i64, scratch_operands = 0 : i64, tpu.core_type = #tpu.core_type<tc>, window_params = [{transform_indices = @transform_0, window_bounds = array<i64: 8, 128>}, {pipeline_mode = #tpu.pipeline_mode<synchronous>, transform_indices = @transform_1, window_bounds = array<i64: 128, 384>}, {pipeline_mode = #tpu.pipeline_mode<synchronous>, transform_indices = @transform_2, window_bounds = array<i64: 1, 384>}, {transform_indices = @transform_3, window_bounds = array<i64: 8, 384>}]} {
    %c0 = arith.constant 0 : index
    %c0_0 = arith.constant 0 : index
    %0 = vector.load %arg1[%c0, %c0_0] : memref<8x128xf32, #tpu.memory_space<vmem>>, vector<8x128xf32>
    %c0_1 = arith.constant 0 : index
    %c0_2 = arith.constant 0 : index
    %1 = vector.load %arg2[%c0_1, %c0_2] : memref<128x384xf32, #tpu.memory_space<vmem>>, vector<128x384xf32>
    %cst = arith.constant dense<0.000000e+00> : vector<8x384xf32>
    %2 = tpu.matmul %0, %1, %cst {dimension_numbers = #tpu.dot_dimension_numbers<[1], [0], [0], [1], [0, 0, 1, 1], [], []>} : vector<8x128xf32>, vector<128x384xf32>, vector<8x384xf32> -> vector<8x384xf32>
    %c0_3 = arith.constant 0 : index
    %c0_4 = arith.constant 0 : index
    %3 = vector.load %arg3[%c0_3, %c0_4] : memref<1x384xf32, #tpu.memory_space<vmem>>, vector<1x384xf32>
    %4 = vector.broadcast %3 : vector<1x384xf32> to vector<8x384xf32>
    %5 = arith.addf %2, %4 : vector<8x384xf32>
    %c0_5 = arith.constant 0 : index
    %c0_6 = arith.constant 0 : index
    %6 = vector.load %arg4[%c0_5, %c0_6] : memref<8x384xf32, #tpu.memory_space<vmem>>, vector<8x384xf32>
    tpu.vector_store %arg4[%c0_5, %c0_6], %5 {strides = array<i32>} : memref<8x384xf32, #tpu.memory_space<vmem>>, vector<8x384xf32>,
    return
  }
  func.func @transform_0(%arg0: i32) -> (i32, i32) {
    %c0_i32 = arith.constant 0 : i32
    %c0_i32_0 = arith.constant 0 : i32
    return %arg0, %c0_i32 : i32, i32
  }
  func.func @transform_1(%arg0: i32) -> (i32, i32) {
    %c0_i32 = arith.constant 0 : i32
    %c0_i32_0 = arith.constant 0 : i32
    %c0_i32_1 = arith.constant 0 : i32
    return %c0_i32, %c0_i32_0 : i32, i32
  }
  func.func @transform_2(%arg0: i32) -> (i32, i32) {
    %c0_i32 = arith.constant 0 : i32
    %c0_i32_0 = arith.constant 0 : i32
    %c0_i32_1 = arith.constant 0 : i32
    return %c0_i32, %c0_i32_0 : i32, i32
  }
  func.func @transform_3(%arg0: i32) -> (i32, i32) {
    %c0_i32 = arith.constant 0 : i32
    %c0_i32_0 = arith.constant 0 : i32
    return %arg0, %c0_i32 : i32, i32
  }
}

module attributes {stable_mosaic.version = 11 : i64} {
  func.func @_attn_block_kernel(%arg0: i32, %arg1: memref<8x384xf32, #tpu.memory_space<vmem>>, %arg2: memref<128x128xf32, #tpu.memory_space<vmem>>, %arg3: memref<1x128xf32, #tpu.memory_space<vmem>>, %arg4: memref<8x128xf32, #tpu.memory_space<vmem>>, %arg5: memref<1x128xf32, #tpu.memory_space<vmem>>, %arg6: memref<1x128xf32, #tpu.memory_space<vmem>>, %arg7: memref<8x128xf32, #tpu.memory_space<vmem>>) attributes {dimension_semantics = [#tpu.dimension_semantics<parallel>], iteration_bounds = array<i64: 2>, scalar_prefetch = 0 : i64, scratch_operands = 0 : i64, tpu.core_type = #tpu.core_type<tc>, window_params = [{transform_indices = @transform_0, window_bounds = array<i64: 8, 384>}, {pipeline_mode = #tpu.pipeline_mode<synchronous>, transform_indices = @transform_1, window_bounds = array<i64: 128, 128>}, {pipeline_mode = #tpu.pipeline_mode<synchronous>, transform_indices = @transform_2, window_bounds = array<i64: 1, 128>}, {transform_indices = @transform_3, window_bounds = array<i64: 8, 128>}, {pipeline_mode = #tpu.pipeline_mode<synchronous>, transform_indices = @transform_4, window_bounds = array<i64: 1, 128>}, {pipeline_mode = #tpu.pipeline_mode<synchronous>, transform_indices = @transform_5, window_bounds = array<i64: 1, 128>}, {transform_indices = @transform_6, window_bounds = array<i64: 8, 128>}]} {
    %c0 = arith.constant 0 : index
    %c0_0 = arith.constant 0 : index
    %0 = vector.load %arg1[%c0, %c0_0] : memref<8x384xf32, #tpu.memory_space<vmem>>, vector<8x384xf32>
    %1 = vector.extract_strided_slice %0 {offsets = [0, 0], sizes = [8, 16], strides = [1, 1]} : vector<8x384xf32> to vector<8x16xf32>
    %2 = vector.extract_strided_slice %0 {offsets = [0, 128], sizes = [8, 16], strides = [1, 1]} : vector<8x384xf32> to vector<8x16xf32>
    %3 = vector.extract_strided_slice %0 {offsets = [0, 256], sizes = [8, 16], strides = [1, 1]} : vector<8x384xf32> to vector<8x16xf32>
    %cst = arith.constant dense<0.000000e+00> : vector<8x8xf32>
    %4 = tpu.matmul %1, %2, %cst {dimension_numbers = #tpu.dot_dimension_numbers<[1], [1], [0], [0], [0, 0, 1, 0], [], []>} : vector<8x16xf32>, vector<8x16xf32>, vector<8x8xf32> -> vector<8x8xf32>
    %cst_1 = arith.constant 2.500000e-01 : f32
    %5 = vector.broadcast %cst_1 : f32 to vector<8x8xf32>
    %6 = arith.mulf %4, %5 : vector<8x8xf32>
    %cst_2 = arith.constant dense<0xFF800000> : vector<8xf32>
    %7 = vector.multi_reduction <maximumf>, %6, %cst_2 [1] : vector<8x8xf32> to vector<8xf32>
    %8 = vector.shape_cast %7 : vector<8xf32> to vector<8x1xf32>
    %9 = vector.broadcast %8 : vector<8x1xf32> to vector<8x8xf32>
    %10 = arith.subf %6, %9 : vector<8x8xf32>
    %11 = math.exp %10 : vector<8x8xf32>
    %cst_3 = arith.constant dense<0.000000e+00> : vector<8xf32>
    %12 = vector.multi_reduction <add>, %11, %cst_3 [1] : vector<8x8xf32> to vector<8xf32>
    %13 = vector.shape_cast %12 : vector<8xf32> to vector<8x1xf32>
    %14 = tpu.reciprocal %13 {approx = true} : vector<8x1xf32> -> vector<8x1xf32>
    %15 = arith.mulf %13, %14 : vector<8x1xf32>
    %cst_4 = arith.constant 2.000000e+00 : f32
    %16 = vector.broadcast %cst_4 : f32 to vector<8x1xf32>
    %17 = arith.subf %16, %15 : vector<8x1xf32>
    %18 = arith.mulf %14, %17 : vector<8x1xf32>
    %19 = vector.broadcast %18 : vector<8x1xf32> to vector<8x8xf32>
    %20 = arith.mulf %11, %19 : vector<8x8xf32>
    %cst_5 = arith.constant dense<0.000000e+00> : vector<8x16xf32>
    %21 = tpu.matmul %20, %3, %cst_5 {dimension_numbers = #tpu.dot_dimension_numbers<[1], [0], [0], [1], [0, 0, 1, 1], [], []>} : vector<8x8xf32>, vector<8x16xf32>, vector<8x16xf32> -> vector<8x16xf32>
    %22 = vector.extract_strided_slice %0 {offsets = [0, 16], sizes = [8, 16], strides = [1, 1]} : vector<8x384xf32> to vector<8x16xf32>
    %23 = vector.extract_strided_slice %0 {offsets = [0, 144], sizes = [8, 16], strides = [1, 1]} : vector<8x384xf32> to vector<8x16xf32>
    %24 = vector.extract_strided_slice %0 {offsets = [0, 272], sizes = [8, 16], strides = [1, 1]} : vector<8x384xf32> to vector<8x16xf32>
    %cst_6 = arith.constant dense<0.000000e+00> : vector<8x8xf32>
    %25 = tpu.matmul %22, %23, %cst_6 {dimension_numbers = #tpu.dot_dimension_numbers<[1], [1], [0], [0], [0, 0, 1, 0], [], []>} : vector<8x16xf32>, vector<8x16xf32>, vector<8x8xf32> -> vector<8x8xf32>
    %cst_7 = arith.constant 2.500000e-01 : f32
    %26 = vector.broadcast %cst_7 : f32 to vector<8x8xf32>
    %27 = arith.mulf %25, %26 : vector<8x8xf32>
    %cst_8 = arith.constant dense<0xFF800000> : vector<8xf32>
    %28 = vector.multi_reduction <maximumf>, %27, %cst_8 [1] : vector<8x8xf32> to vector<8xf32>
    %29 = vector.shape_cast %28 : vector<8xf32> to vector<8x1xf32>
    %30 = vector.broadcast %29 : vector<8x1xf32> to vector<8x8xf32>
    %31 = arith.subf %27, %30 : vector<8x8xf32>
    %32 = math.exp %31 : vector<8x8xf32>
    %cst_9 = arith.constant dense<0.000000e+00> : vector<8xf32>
    %33 = vector.multi_reduction <add>, %32, %cst_9 [1] : vector<8x8xf32> to vector<8xf32>
    %34 = vector.shape_cast %33 : vector<8xf32> to vector<8x1xf32>
    %35 = tpu.reciprocal %34 {approx = true} : vector<8x1xf32> -> vector<8x1xf32>
    %36 = arith.mulf %34, %35 : vector<8x1xf32>
    %cst_10 = arith.constant 2.000000e+00 : f32
    %37 = vector.broadcast %cst_10 : f32 to vector<8x1xf32>
    %38 = arith.subf %37, %36 : vector<8x1xf32>
    %39 = arith.mulf %35, %38 : vector<8x1xf32>
    %40 = vector.broadcast %39 : vector<8x1xf32> to vector<8x8xf32>
    %41 = arith.mulf %32, %40 : vector<8x8xf32>
    %cst_11 = arith.constant dense<0.000000e+00> : vector<8x16xf32>
    %42 = tpu.matmul %41, %24, %cst_11 {dimension_numbers = #tpu.dot_dimension_numbers<[1], [0], [0], [1], [0, 0, 1, 1], [], []>} : vector<8x8xf32>, vector<8x16xf32>, vector<8x16xf32> -> vector<8x16xf32>
    %43 = vector.extract_strided_slice %0 {offsets = [0, 32], sizes = [8, 16], strides = [1, 1]} : vector<8x384xf32> to vector<8x16xf32>
    %44 = vector.extract_strided_slice %0 {offsets = [0, 160], sizes = [8, 16], strides = [1, 1]} : vector<8x384xf32> to vector<8x16xf32>
    %45 = vector.extract_strided_slice %0 {offsets = [0, 288], sizes = [8, 16], strides = [1, 1]} : vector<8x384xf32> to vector<8x16xf32>
    %cst_12 = arith.constant dense<0.000000e+00> : vector<8x8xf32>
    %46 = tpu.matmul %43, %44, %cst_12 {dimension_numbers = #tpu.dot_dimension_numbers<[1], [1], [0], [0], [0, 0, 1, 0], [], []>} : vector<8x16xf32>, vector<8x16xf32>, vector<8x8xf32> -> vector<8x8xf32>
    %cst_13 = arith.constant 2.500000e-01 : f32
    %47 = vector.broadcast %cst_13 : f32 to vector<8x8xf32>
    %48 = arith.mulf %46, %47 : vector<8x8xf32>
    %cst_14 = arith.constant dense<0xFF800000> : vector<8xf32>
    %49 = vector.multi_reduction <maximumf>, %48, %cst_14 [1] : vector<8x8xf32> to vector<8xf32>
    %50 = vector.shape_cast %49 : vector<8xf32> to vector<8x1xf32>
    %51 = vector.broadcast %50 : vector<8x1xf32> to vector<8x8xf32>
    %52 = arith.subf %48, %51 : vector<8x8xf32>
    %53 = math.exp %52 : vector<8x8xf32>
    %cst_15 = arith.constant dense<0.000000e+00> : vector<8xf32>
    %54 = vector.multi_reduction <add>, %53, %cst_15 [1] : vector<8x8xf32> to vector<8xf32>
    %55 = vector.shape_cast %54 : vector<8xf32> to vector<8x1xf32>
    %56 = tpu.reciprocal %55 {approx = true} : vector<8x1xf32> -> vector<8x1xf32>
    %57 = arith.mulf %55, %56 : vector<8x1xf32>
    %cst_16 = arith.constant 2.000000e+00 : f32
    %58 = vector.broadcast %cst_16 : f32 to vector<8x1xf32>
    %59 = arith.subf %58, %57 : vector<8x1xf32>
    %60 = arith.mulf %56, %59 : vector<8x1xf32>
    %61 = vector.broadcast %60 : vector<8x1xf32> to vector<8x8xf32>
    %62 = arith.mulf %53, %61 : vector<8x8xf32>
    %cst_17 = arith.constant dense<0.000000e+00> : vector<8x16xf32>
    %63 = tpu.matmul %62, %45, %cst_17 {dimension_numbers = #tpu.dot_dimension_numbers<[1], [0], [0], [1], [0, 0, 1, 1], [], []>} : vector<8x8xf32>, vector<8x16xf32>, vector<8x16xf32> -> vector<8x16xf32>
    %64 = vector.extract_strided_slice %0 {offsets = [0, 48], sizes = [8, 16], strides = [1, 1]} : vector<8x384xf32> to vector<8x16xf32>
    %65 = vector.extract_strided_slice %0 {offsets = [0, 176], sizes = [8, 16], strides = [1, 1]} : vector<8x384xf32> to vector<8x16xf32>
    %66 = vector.extract_strided_slice %0 {offsets = [0, 304], sizes = [8, 16], strides = [1, 1]} : vector<8x384xf32> to vector<8x16xf32>
    %cst_18 = arith.constant dense<0.000000e+00> : vector<8x8xf32>
    %67 = tpu.matmul %64, %65, %cst_18 {dimension_numbers = #tpu.dot_dimension_numbers<[1], [1], [0], [0], [0, 0, 1, 0], [], []>} : vector<8x16xf32>, vector<8x16xf32>, vector<8x8xf32> -> vector<8x8xf32>
    %cst_19 = arith.constant 2.500000e-01 : f32
    %68 = vector.broadcast %cst_19 : f32 to vector<8x8xf32>
    %69 = arith.mulf %67, %68 : vector<8x8xf32>
    %cst_20 = arith.constant dense<0xFF800000> : vector<8xf32>
    %70 = vector.multi_reduction <maximumf>, %69, %cst_20 [1] : vector<8x8xf32> to vector<8xf32>
    %71 = vector.shape_cast %70 : vector<8xf32> to vector<8x1xf32>
    %72 = vector.broadcast %71 : vector<8x1xf32> to vector<8x8xf32>
    %73 = arith.subf %69, %72 : vector<8x8xf32>
    %74 = math.exp %73 : vector<8x8xf32>
    %cst_21 = arith.constant dense<0.000000e+00> : vector<8xf32>
    %75 = vector.multi_reduction <add>, %74, %cst_21 [1] : vector<8x8xf32> to vector<8xf32>
    %76 = vector.shape_cast %75 : vector<8xf32> to vector<8x1xf32>
    %77 = tpu.reciprocal %76 {approx = true} : vector<8x1xf32> -> vector<8x1xf32>
    %78 = arith.mulf %76, %77 : vector<8x1xf32>
    %cst_22 = arith.constant 2.000000e+00 : f32
    %79 = vector.broadcast %cst_22 : f32 to vector<8x1xf32>
    %80 = arith.subf %79, %78 : vector<8x1xf32>
    %81 = arith.mulf %77, %80 : vector<8x1xf32>
    %82 = vector.broadcast %81 : vector<8x1xf32> to vector<8x8xf32>
    %83 = arith.mulf %74, %82 : vector<8x8xf32>
    %cst_23 = arith.constant dense<0.000000e+00> : vector<8x16xf32>
    %84 = tpu.matmul %83, %66, %cst_23 {dimension_numbers = #tpu.dot_dimension_numbers<[1], [0], [0], [1], [0, 0, 1, 1], [], []>} : vector<8x8xf32>, vector<8x16xf32>, vector<8x16xf32> -> vector<8x16xf32>
    %85 = vector.extract_strided_slice %0 {offsets = [0, 64], sizes = [8, 16], strides = [1, 1]} : vector<8x384xf32> to vector<8x16xf32>
    %86 = vector.extract_strided_slice %0 {offsets = [0, 192], sizes = [8, 16], strides = [1, 1]} : vector<8x384xf32> to vector<8x16xf32>
    %87 = vector.extract_strided_slice %0 {offsets = [0, 320], sizes = [8, 16], strides = [1, 1]} : vector<8x384xf32> to vector<8x16xf32>
    %cst_24 = arith.constant dense<0.000000e+00> : vector<8x8xf32>
    %88 = tpu.matmul %85, %86, %cst_24 {dimension_numbers = #tpu.dot_dimension_numbers<[1], [1], [0], [0], [0, 0, 1, 0], [], []>} : vector<8x16xf32>, vector<8x16xf32>, vector<8x8xf32> -> vector<8x8xf32>
    %cst_25 = arith.constant 2.500000e-01 : f32
    %89 = vector.broadcast %cst_25 : f32 to vector<8x8xf32>
    %90 = arith.mulf %88, %89 : vector<8x8xf32>
    %cst_26 = arith.constant dense<0xFF800000> : vector<8xf32>
    %91 = vector.multi_reduction <maximumf>, %90, %cst_26 [1] : vector<8x8xf32> to vector<8xf32>
    %92 = vector.shape_cast %91 : vector<8xf32> to vector<8x1xf32>
    %93 = vector.broadcast %92 : vector<8x1xf32> to vector<8x8xf32>
    %94 = arith.subf %90, %93 : vector<8x8xf32>
    %95 = math.exp %94 : vector<8x8xf32>
    %cst_27 = arith.constant dense<0.000000e+00> : vector<8xf32>
    %96 = vector.multi_reduction <add>, %95, %cst_27 [1] : vector<8x8xf32> to vector<8xf32>
    %97 = vector.shape_cast %96 : vector<8xf32> to vector<8x1xf32>
    %98 = tpu.reciprocal %97 {approx = true} : vector<8x1xf32> -> vector<8x1xf32>
    %99 = arith.mulf %97, %98 : vector<8x1xf32>
    %cst_28 = arith.constant 2.000000e+00 : f32
    %100 = vector.broadcast %cst_28 : f32 to vector<8x1xf32>
    %101 = arith.subf %100, %99 : vector<8x1xf32>
    %102 = arith.mulf %98, %101 : vector<8x1xf32>
    %103 = vector.broadcast %102 : vector<8x1xf32> to vector<8x8xf32>
    %104 = arith.mulf %95, %103 : vector<8x8xf32>
    %cst_29 = arith.constant dense<0.000000e+00> : vector<8x16xf32>
    %105 = tpu.matmul %104, %87, %cst_29 {dimension_numbers = #tpu.dot_dimension_numbers<[1], [0], [0], [1], [0, 0, 1, 1], [], []>} : vector<8x8xf32>, vector<8x16xf32>, vector<8x16xf32> -> vector<8x16xf32>
    %106 = vector.extract_strided_slice %0 {offsets = [0, 80], sizes = [8, 16], strides = [1, 1]} : vector<8x384xf32> to vector<8x16xf32>
    %107 = vector.extract_strided_slice %0 {offsets = [0, 208], sizes = [8, 16], strides = [1, 1]} : vector<8x384xf32> to vector<8x16xf32>
    %108 = vector.extract_strided_slice %0 {offsets = [0, 336], sizes = [8, 16], strides = [1, 1]} : vector<8x384xf32> to vector<8x16xf32>
    %cst_30 = arith.constant dense<0.000000e+00> : vector<8x8xf32>
    %109 = tpu.matmul %106, %107, %cst_30 {dimension_numbers = #tpu.dot_dimension_numbers<[1], [1], [0], [0], [0, 0, 1, 0], [], []>} : vector<8x16xf32>, vector<8x16xf32>, vector<8x8xf32> -> vector<8x8xf32>
    %cst_31 = arith.constant 2.500000e-01 : f32
    %110 = vector.broadcast %cst_31 : f32 to vector<8x8xf32>
    %111 = arith.mulf %109, %110 : vector<8x8xf32>
    %cst_32 = arith.constant dense<0xFF800000> : vector<8xf32>
    %112 = vector.multi_reduction <maximumf>, %111, %cst_32 [1] : vector<8x8xf32> to vector<8xf32>
    %113 = vector.shape_cast %112 : vector<8xf32> to vector<8x1xf32>
    %114 = vector.broadcast %113 : vector<8x1xf32> to vector<8x8xf32>
    %115 = arith.subf %111, %114 : vector<8x8xf32>
    %116 = math.exp %115 : vector<8x8xf32>
    %cst_33 = arith.constant dense<0.000000e+00> : vector<8xf32>
    %117 = vector.multi_reduction <add>, %116, %cst_33 [1] : vector<8x8xf32> to vector<8xf32>
    %118 = vector.shape_cast %117 : vector<8xf32> to vector<8x1xf32>
    %119 = tpu.reciprocal %118 {approx = true} : vector<8x1xf32> -> vector<8x1xf32>
    %120 = arith.mulf %118, %119 : vector<8x1xf32>
    %cst_34 = arith.constant 2.000000e+00 : f32
    %121 = vector.broadcast %cst_34 : f32 to vector<8x1xf32>
    %122 = arith.subf %121, %120 : vector<8x1xf32>
    %123 = arith.mulf %119, %122 : vector<8x1xf32>
    %124 = vector.broadcast %123 : vector<8x1xf32> to vector<8x8xf32>
    %125 = arith.mulf %116, %124 : vector<8x8xf32>
    %cst_35 = arith.constant dense<0.000000e+00> : vector<8x16xf32>
    %126 = tpu.matmul %125, %108, %cst_35 {dimension_numbers = #tpu.dot_dimension_numbers<[1], [0], [0], [1], [0, 0, 1, 1], [], []>} : vector<8x8xf32>, vector<8x16xf32>, vector<8x16xf32> -> vector<8x16xf32>
    %127 = vector.extract_strided_slice %0 {offsets = [0, 96], sizes = [8, 16], strides = [1, 1]} : vector<8x384xf32> to vector<8x16xf32>
    %128 = vector.extract_strided_slice %0 {offsets = [0, 224], sizes = [8, 16], strides = [1, 1]} : vector<8x384xf32> to vector<8x16xf32>
    %129 = vector.extract_strided_slice %0 {offsets = [0, 352], sizes = [8, 16], strides = [1, 1]} : vector<8x384xf32> to vector<8x16xf32>
    %cst_36 = arith.constant dense<0.000000e+00> : vector<8x8xf32>
    %130 = tpu.matmul %127, %128, %cst_36 {dimension_numbers = #tpu.dot_dimension_numbers<[1], [1], [0], [0], [0, 0, 1, 0], [], []>} : vector<8x16xf32>, vector<8x16xf32>, vector<8x8xf32> -> vector<8x8xf32>
    %cst_37 = arith.constant 2.500000e-01 : f32
    %131 = vector.broadcast %cst_37 : f32 to vector<8x8xf32>
    %132 = arith.mulf %130, %131 : vector<8x8xf32>
    %cst_38 = arith.constant dense<0xFF800000> : vector<8xf32>
    %133 = vector.multi_reduction <maximumf>, %132, %cst_38 [1] : vector<8x8xf32> to vector<8xf32>
    %134 = vector.shape_cast %133 : vector<8xf32> to vector<8x1xf32>
    %135 = vector.broadcast %134 : vector<8x1xf32> to vector<8x8xf32>
    %136 = arith.subf %132, %135 : vector<8x8xf32>
    %137 = math.exp %136 : vector<8x8xf32>
    %cst_39 = arith.constant dense<0.000000e+00> : vector<8xf32>
    %138 = vector.multi_reduction <add>, %137, %cst_39 [1] : vector<8x8xf32> to vector<8xf32>
    %139 = vector.shape_cast %138 : vector<8xf32> to vector<8x1xf32>
    %140 = tpu.reciprocal %139 {approx = true} : vector<8x1xf32> -> vector<8x1xf32>
    %141 = arith.mulf %139, %140 : vector<8x1xf32>
    %cst_40 = arith.constant 2.000000e+00 : f32
    %142 = vector.broadcast %cst_40 : f32 to vector<8x1xf32>
    %143 = arith.subf %142, %141 : vector<8x1xf32>
    %144 = arith.mulf %140, %143 : vector<8x1xf32>
    %145 = vector.broadcast %144 : vector<8x1xf32> to vector<8x8xf32>
    %146 = arith.mulf %137, %145 : vector<8x8xf32>
    %cst_41 = arith.constant dense<0.000000e+00> : vector<8x16xf32>
    %147 = tpu.matmul %146, %129, %cst_41 {dimension_numbers = #tpu.dot_dimension_numbers<[1], [0], [0], [1], [0, 0, 1, 1], [], []>} : vector<8x8xf32>, vector<8x16xf32>, vector<8x16xf32> -> vector<8x16xf32>
    %148 = vector.extract_strided_slice %0 {offsets = [0, 112], sizes = [8, 16], strides = [1, 1]} : vector<8x384xf32> to vector<8x16xf32>
    %149 = vector.extract_strided_slice %0 {offsets = [0, 240], sizes = [8, 16], strides = [1, 1]} : vector<8x384xf32> to vector<8x16xf32>
    %150 = vector.extract_strided_slice %0 {offsets = [0, 368], sizes = [8, 16], strides = [1, 1]} : vector<8x384xf32> to vector<8x16xf32>
    %cst_42 = arith.constant dense<0.000000e+00> : vector<8x8xf32>
    %151 = tpu.matmul %148, %149, %cst_42 {dimension_numbers = #tpu.dot_dimension_numbers<[1], [1], [0], [0], [0, 0, 1, 0], [], []>} : vector<8x16xf32>, vector<8x16xf32>, vector<8x8xf32> -> vector<8x8xf32>
    %cst_43 = arith.constant 2.500000e-01 : f32
    %152 = vector.broadcast %cst_43 : f32 to vector<8x8xf32>
    %153 = arith.mulf %151, %152 : vector<8x8xf32>
    %cst_44 = arith.constant dense<0xFF800000> : vector<8xf32>
    %154 = vector.multi_reduction <maximumf>, %153, %cst_44 [1] : vector<8x8xf32> to vector<8xf32>
    %155 = vector.shape_cast %154 : vector<8xf32> to vector<8x1xf32>
    %156 = vector.broadcast %155 : vector<8x1xf32> to vector<8x8xf32>
    %157 = arith.subf %153, %156 : vector<8x8xf32>
    %158 = math.exp %157 : vector<8x8xf32>
    %cst_45 = arith.constant dense<0.000000e+00> : vector<8xf32>
    %159 = vector.multi_reduction <add>, %158, %cst_45 [1] : vector<8x8xf32> to vector<8xf32>
    %160 = vector.shape_cast %159 : vector<8xf32> to vector<8x1xf32>
    %161 = tpu.reciprocal %160 {approx = true} : vector<8x1xf32> -> vector<8x1xf32>
    %162 = arith.mulf %160, %161 : vector<8x1xf32>
    %cst_46 = arith.constant 2.000000e+00 : f32
    %163 = vector.broadcast %cst_46 : f32 to vector<8x1xf32>
    %164 = arith.subf %163, %162 : vector<8x1xf32>
    %165 = arith.mulf %161, %164 : vector<8x1xf32>
    %166 = vector.broadcast %165 : vector<8x1xf32> to vector<8x8xf32>
    %167 = arith.mulf %158, %166 : vector<8x8xf32>
    %cst_47 = arith.constant dense<0.000000e+00> : vector<8x16xf32>
    %168 = tpu.matmul %167, %150, %cst_47 {dimension_numbers = #tpu.dot_dimension_numbers<[1], [0], [0], [1], [0, 0, 1, 1], [], []>} : vector<8x8xf32>, vector<8x16xf32>, vector<8x16xf32> -> vector<8x16xf32>
    %169 = tpu.concatenate %21, %42, %63, %84, %105, %126, %147, %168 in 1 : vector<8x16xf32>, vector<8x16xf32>, vector<8x16xf32>, vector<8x16xf32>, vector<8x16xf32>, vector<8x16xf32>, vector<8x16xf32>, vector<8x16xf32> -> vector<8x128xf32>
    %c0_48 = arith.constant 0 : index
    %c0_49 = arith.constant 0 : index
    %170 = vector.load %arg2[%c0_48, %c0_49] : memref<128x128xf32, #tpu.memory_space<vmem>>, vector<128x128xf32>
    %cst_50 = arith.constant dense<0.000000e+00> : vector<8x128xf32>
    %171 = tpu.matmul %169, %170, %cst_50 {dimension_numbers = #tpu.dot_dimension_numbers<[1], [0], [0], [1], [0, 0, 1, 1], [], []>} : vector<8x128xf32>, vector<128x128xf32>, vector<8x128xf32> -> vector<8x128xf32>
    %c0_51 = arith.constant 0 : index
    %c0_52 = arith.constant 0 : index
    %172 = vector.load %arg3[%c0_51, %c0_52] : memref<1x128xf32, #tpu.memory_space<vmem>>, vector<1x128xf32>
    %173 = vector.broadcast %172 : vector<1x128xf32> to vector<8x128xf32>
    %174 = arith.addf %171, %173 : vector<8x128xf32>
    %c0_53 = arith.constant 0 : index
    %c0_54 = arith.constant 0 : index
    %175 = vector.load %arg4[%c0_53, %c0_54] : memref<8x128xf32, #tpu.memory_space<vmem>>, vector<8x128xf32>
    %c0_55 = arith.constant 0 : index
    %c0_56 = arith.constant 0 : index
    %176 = vector.load %arg5[%c0_55, %c0_56] : memref<1x128xf32, #tpu.memory_space<vmem>>, vector<1x128xf32>
    %c0_57 = arith.constant 0 : index
    %c0_58 = arith.constant 0 : index
    %177 = vector.load %arg6[%c0_57, %c0_58] : memref<1x128xf32, #tpu.memory_space<vmem>>, vector<1x128xf32>
    %178 = arith.addf %174, %175 : vector<8x128xf32>
    %cst_59 = arith.constant dense<0.000000e+00> : vector<8xf32>
    %179 = vector.multi_reduction <add>, %178, %cst_59 [1] : vector<8x128xf32> to vector<8xf32>
    %180 = vector.shape_cast %179 : vector<8xf32> to vector<8x1xf32>
    %cst_60 = arith.constant 1.280000e+02 : f32
    %181 = vector.broadcast %cst_60 : f32 to vector<8x1xf32>
    %182 = arith.divf %180, %181 : vector<8x1xf32>
    %183 = vector.broadcast %182 : vector<8x1xf32> to vector<8x128xf32>
    %184 = arith.subf %178, %183 : vector<8x128xf32>
    %185 = arith.mulf %184, %184 : vector<8x128xf32>
    %cst_61 = arith.constant dense<0.000000e+00> : vector<8xf32>
    %186 = vector.multi_reduction <add>, %185, %cst_61 [1] : vector<8x128xf32> to vector<8xf32>
    %187 = vector.shape_cast %186 : vector<8xf32> to vector<8x1xf32>
    %cst_62 = arith.constant 0.00787401571 : f32
    %188 = vector.broadcast %cst_62 : f32 to vector<8x1xf32>
    %189 = arith.mulf %187, %188 : vector<8x1xf32>
    %190 = math.sqrt %189 : vector<8x1xf32>
    %191 = vector.broadcast %176 : vector<1x128xf32> to vector<8x128xf32>
    %192 = arith.mulf %191, %184 : vector<8x128xf32>
    %cst_63 = arith.constant 2.000000e-01 : f32
    %193 = vector.broadcast %cst_63 : f32 to vector<8x1xf32>
    %194 = arith.addf %190, %193 : vector<8x1xf32>
    %195 = tpu.reciprocal %194 {approx = true} : vector<8x1xf32> -> vector<8x1xf32>
    %196 = arith.mulf %194, %195 : vector<8x1xf32>
    %cst_64 = arith.constant 2.000000e+00 : f32
    %197 = vector.broadcast %cst_64 : f32 to vector<8x1xf32>
    %198 = arith.subf %197, %196 : vector<8x1xf32>
    %199 = arith.mulf %195, %198 : vector<8x1xf32>
    %200 = vector.broadcast %199 : vector<8x1xf32> to vector<8x128xf32>
    %201 = arith.mulf %192, %200 : vector<8x128xf32>
    %202 = vector.broadcast %177 : vector<1x128xf32> to vector<8x128xf32>
    %203 = arith.addf %201, %202 : vector<8x128xf32>
    %c0_65 = arith.constant 0 : index
    %c0_66 = arith.constant 0 : index
    %204 = vector.load %arg7[%c0_65, %c0_66] : memref<8x128xf32, #tpu.memory_space<vmem>>, vector<8x128xf32>
    tpu.vector_store %arg7[%c0_65, %c0_66], %203 {strides = array<i32>} : memref<8x128xf32, #tpu.memory_space<vmem>>, vector<8x128xf32>,
    return
  }
  func.func @transform_0(%arg0: i32) -> (i32, i32) {
    %c0_i32 = arith.constant 0 : i32
    %c0_i32_0 = arith.constant 0 : i32
    return %arg0, %c0_i32 : i32, i32
  }
  func.func @transform_1(%arg0: i32) -> (i32, i32) {
    %c0_i32 = arith.constant 0 : i32
    %c0_i32_0 = arith.constant 0 : i32
    %c0_i32_1 = arith.constant 0 : i32
    return %c0_i32, %c0_i32_0 : i32, i32
  }
  func.func @transform_2(%arg0: i32) -> (i32, i32) {
    %c0_i32 = arith.constant 0 : i32
    %c0_i32_0 = arith.constant 0 : i32
    %c0_i32_1 = arith.constant 0 : i32
    return %c0_i32, %c0_i32_0 : i32, i32
  }
  func.func @transform_3(%arg0: i32) -> (i32, i32) {
    %c0_i32 = arith.constant 0 : i32
    %c0_i32_0 = arith.constant 0 : i32
    return %arg0, %c0_i32 : i32, i32
  }
  func.func @transform_4(%arg0: i32) -> (i32, i32) {
    %c0_i32 = arith.constant 0 : i32
    %c0_i32_0 = arith.constant 0 : i32
    %c0_i32_1 = arith.constant 0 : i32
    return %c0_i32, %c0_i32_0 : i32, i32
  }
  func.func @transform_5(%arg0: i32) -> (i32, i32) {
    %c0_i32 = arith.constant 0 : i32
    %c0_i32_0 = arith.constant 0 : i32
    %c0_i32_1 = arith.constant 0 : i32
    return %c0_i32, %c0_i32_0 : i32, i32
  }
  func.func @transform_6(%arg0: i32) -> (i32, i32) {
    %c0_i32 = arith.constant 0 : i32
    %c0_i32_0 = arith.constant 0 : i32
    return %arg0, %c0_i32 : i32, i32
  }
}

module attributes {stable_mosaic.version = 11 : i64} {
  func.func @_ffn_norm_kernel(%arg0: i32, %arg1: memref<8x128xf32, #tpu.memory_space<vmem>>, %arg2: memref<128x128xf32, #tpu.memory_space<vmem>>, %arg3: memref<1x128xf32, #tpu.memory_space<vmem>>, %arg4: memref<128x128xf32, #tpu.memory_space<vmem>>, %arg5: memref<1x128xf32, #tpu.memory_space<vmem>>, %arg6: memref<1x128xf32, #tpu.memory_space<vmem>>, %arg7: memref<1x128xf32, #tpu.memory_space<vmem>>, %arg8: memref<8x128xf32, #tpu.memory_space<vmem>>) attributes {dimension_semantics = [#tpu.dimension_semantics<parallel>], iteration_bounds = array<i64: 2>, scalar_prefetch = 0 : i64, scratch_operands = 0 : i64, tpu.core_type = #tpu.core_type<tc>, window_params = [{transform_indices = @transform_0, window_bounds = array<i64: 8, 128>}, {pipeline_mode = #tpu.pipeline_mode<synchronous>, transform_indices = @transform_1, window_bounds = array<i64: 128, 128>}, {pipeline_mode = #tpu.pipeline_mode<synchronous>, transform_indices = @transform_2, window_bounds = array<i64: 1, 128>}, {pipeline_mode = #tpu.pipeline_mode<synchronous>, transform_indices = @transform_3, window_bounds = array<i64: 128, 128>}, {pipeline_mode = #tpu.pipeline_mode<synchronous>, transform_indices = @transform_4, window_bounds = array<i64: 1, 128>}, {pipeline_mode = #tpu.pipeline_mode<synchronous>, transform_indices = @transform_5, window_bounds = array<i64: 1, 128>}, {pipeline_mode = #tpu.pipeline_mode<synchronous>, transform_indices = @transform_6, window_bounds = array<i64: 1, 128>}, {transform_indices = @transform_7, window_bounds = array<i64: 8, 128>}]} {
    %c0 = arith.constant 0 : index
    %c0_0 = arith.constant 0 : index
    %0 = vector.load %arg1[%c0, %c0_0] : memref<8x128xf32, #tpu.memory_space<vmem>>, vector<8x128xf32>
    %c0_1 = arith.constant 0 : index
    %c0_2 = arith.constant 0 : index
    %1 = vector.load %arg2[%c0_1, %c0_2] : memref<128x128xf32, #tpu.memory_space<vmem>>, vector<128x128xf32>
    %cst = arith.constant dense<0.000000e+00> : vector<8x128xf32>
    %2 = tpu.matmul %0, %1, %cst {dimension_numbers = #tpu.dot_dimension_numbers<[1], [0], [0], [1], [0, 0, 1, 1], [], []>} : vector<8x128xf32>, vector<128x128xf32>, vector<8x128xf32> -> vector<8x128xf32>
    %c0_3 = arith.constant 0 : index
    %c0_4 = arith.constant 0 : index
    %3 = vector.load %arg3[%c0_3, %c0_4] : memref<1x128xf32, #tpu.memory_space<vmem>>, vector<1x128xf32>
    %4 = vector.broadcast %3 : vector<1x128xf32> to vector<8x128xf32>
    %5 = arith.addf %2, %4 : vector<8x128xf32>
    %cst_5 = arith.constant 0.000000e+00 : f32
    %6 = vector.broadcast %cst_5 : f32 to vector<8x128xf32>
    %7 = arith.maximumf %5, %6 : vector<8x128xf32>
    %c0_6 = arith.constant 0 : index
    %c0_7 = arith.constant 0 : index
    %8 = vector.load %arg4[%c0_6, %c0_7] : memref<128x128xf32, #tpu.memory_space<vmem>>, vector<128x128xf32>
    %cst_8 = arith.constant dense<0.000000e+00> : vector<8x128xf32>
    %9 = tpu.matmul %7, %8, %cst_8 {dimension_numbers = #tpu.dot_dimension_numbers<[1], [0], [0], [1], [0, 0, 1, 1], [], []>} : vector<8x128xf32>, vector<128x128xf32>, vector<8x128xf32> -> vector<8x128xf32>
    %c0_9 = arith.constant 0 : index
    %c0_10 = arith.constant 0 : index
    %10 = vector.load %arg5[%c0_9, %c0_10] : memref<1x128xf32, #tpu.memory_space<vmem>>, vector<1x128xf32>
    %11 = vector.broadcast %10 : vector<1x128xf32> to vector<8x128xf32>
    %12 = arith.addf %9, %11 : vector<8x128xf32>
    %c0_11 = arith.constant 0 : index
    %c0_12 = arith.constant 0 : index
    %13 = vector.load %arg6[%c0_11, %c0_12] : memref<1x128xf32, #tpu.memory_space<vmem>>, vector<1x128xf32>
    %c0_13 = arith.constant 0 : index
    %c0_14 = arith.constant 0 : index
    %14 = vector.load %arg7[%c0_13, %c0_14] : memref<1x128xf32, #tpu.memory_space<vmem>>, vector<1x128xf32>
    %15 = arith.addf %12, %0 : vector<8x128xf32>
    %cst_15 = arith.constant dense<0.000000e+00> : vector<8xf32>
    %16 = vector.multi_reduction <add>, %15, %cst_15 [1] : vector<8x128xf32> to vector<8xf32>
    %17 = vector.shape_cast %16 : vector<8xf32> to vector<8x1xf32>
    %cst_16 = arith.constant 1.280000e+02 : f32
    %18 = vector.broadcast %cst_16 : f32 to vector<8x1xf32>
    %19 = arith.divf %17, %18 : vector<8x1xf32>
    %20 = vector.broadcast %19 : vector<8x1xf32> to vector<8x128xf32>
    %21 = arith.subf %15, %20 : vector<8x128xf32>
    %22 = arith.mulf %21, %21 : vector<8x128xf32>
    %cst_17 = arith.constant dense<0.000000e+00> : vector<8xf32>
    %23 = vector.multi_reduction <add>, %22, %cst_17 [1] : vector<8x128xf32> to vector<8xf32>
    %24 = vector.shape_cast %23 : vector<8xf32> to vector<8x1xf32>
    %cst_18 = arith.constant 0.00787401571 : f32
    %25 = vector.broadcast %cst_18 : f32 to vector<8x1xf32>
    %26 = arith.mulf %24, %25 : vector<8x1xf32>
    %27 = math.sqrt %26 : vector<8x1xf32>
    %28 = vector.broadcast %13 : vector<1x128xf32> to vector<8x128xf32>
    %29 = arith.mulf %28, %21 : vector<8x128xf32>
    %cst_19 = arith.constant 2.000000e-01 : f32
    %30 = vector.broadcast %cst_19 : f32 to vector<8x1xf32>
    %31 = arith.addf %27, %30 : vector<8x1xf32>
    %32 = tpu.reciprocal %31 {approx = true} : vector<8x1xf32> -> vector<8x1xf32>
    %33 = arith.mulf %31, %32 : vector<8x1xf32>
    %cst_20 = arith.constant 2.000000e+00 : f32
    %34 = vector.broadcast %cst_20 : f32 to vector<8x1xf32>
    %35 = arith.subf %34, %33 : vector<8x1xf32>
    %36 = arith.mulf %32, %35 : vector<8x1xf32>
    %37 = vector.broadcast %36 : vector<8x1xf32> to vector<8x128xf32>
    %38 = arith.mulf %29, %37 : vector<8x128xf32>
    %39 = vector.broadcast %14 : vector<1x128xf32> to vector<8x128xf32>
    %40 = arith.addf %38, %39 : vector<8x128xf32>
    %c0_21 = arith.constant 0 : index
    %c0_22 = arith.constant 0 : index
    %41 = vector.load %arg8[%c0_21, %c0_22] : memref<8x128xf32, #tpu.memory_space<vmem>>, vector<8x128xf32>
    tpu.vector_store %arg8[%c0_21, %c0_22], %40 {strides = array<i32>} : memref<8x128xf32, #tpu.memory_space<vmem>>, vector<8x128xf32>,
    return
  }
  func.func @transform_0(%arg0: i32) -> (i32, i32) {
    %c0_i32 = arith.constant 0 : i32
    %c0_i32_0 = arith.constant 0 : i32
    return %arg0, %c0_i32 : i32, i32
  }
  func.func @transform_1(%arg0: i32) -> (i32, i32) {
    %c0_i32 = arith.constant 0 : i32
    %c0_i32_0 = arith.constant 0 : i32
    %c0_i32_1 = arith.constant 0 : i32
    return %c0_i32, %c0_i32_0 : i32, i32
  }
  func.func @transform_2(%arg0: i32) -> (i32, i32) {
    %c0_i32 = arith.constant 0 : i32
    %c0_i32_0 = arith.constant 0 : i32
    %c0_i32_1 = arith.constant 0 : i32
    return %c0_i32, %c0_i32_0 : i32, i32
  }
  func.func @transform_3(%arg0: i32) -> (i32, i32) {
    %c0_i32 = arith.constant 0 : i32
    %c0_i32_0 = arith.constant 0 : i32
    %c0_i32_1 = arith.constant 0 : i32
    return %c0_i32, %c0_i32_0 : i32, i32
  }
  func.func @transform_4(%arg0: i32) -> (i32, i32) {
    %c0_i32 = arith.constant 0 : i32
    %c0_i32_0 = arith.constant 0 : i32
    %c0_i32_1 = arith.constant 0 : i32
    return %c0_i32, %c0_i32_0 : i32, i32
  }
  func.func @transform_5(%arg0: i32) -> (i32, i32) {
    %c0_i32 = arith.constant 0 : i32
    %c0_i32_0 = arith.constant 0 : i32
    %c0_i32_1 = arith.constant 0 : i32
    return %c0_i32, %c0_i32_0 : i32, i32
  }
  func.func @transform_6(%arg0: i32) -> (i32, i32) {
    %c0_i32 = arith.constant 0 : i32
    %c0_i32_0 = arith.constant 0 : i32
    %c0_i32_1 = arith.constant 0 : i32
    return %c0_i32, %c0_i32_0 : i32, i32
  }
  func.func @transform_7(%arg0: i32) -> (i32, i32) {
    %c0_i32 = arith.constant 0 : i32
    %c0_i32_0 = arith.constant 0 : i32
    return %arg0, %c0_i32 : i32, i32
  }
}

module attributes {stable_mosaic.version = 11 : i64} {
  func.func @_qkv_kernel(%arg0: i32, %arg1: memref<8x128xf32, #tpu.memory_space<vmem>>, %arg2: memref<128x384xf32, #tpu.memory_space<vmem>>, %arg3: memref<1x384xf32, #tpu.memory_space<vmem>>, %arg4: memref<8x384xf32, #tpu.memory_space<vmem>>) attributes {dimension_semantics = [#tpu.dimension_semantics<parallel>], iteration_bounds = array<i64: 2>, scalar_prefetch = 0 : i64, scratch_operands = 0 : i64, tpu.core_type = #tpu.core_type<tc>, window_params = [{transform_indices = @transform_0, window_bounds = array<i64: 8, 128>}, {pipeline_mode = #tpu.pipeline_mode<synchronous>, transform_indices = @transform_1, window_bounds = array<i64: 128, 384>}, {pipeline_mode = #tpu.pipeline_mode<synchronous>, transform_indices = @transform_2, window_bounds = array<i64: 1, 384>}, {transform_indices = @transform_3, window_bounds = array<i64: 8, 384>}]} {
    %c0 = arith.constant 0 : index
    %c0_0 = arith.constant 0 : index
    %0 = vector.load %arg1[%c0, %c0_0] : memref<8x128xf32, #tpu.memory_space<vmem>>, vector<8x128xf32>
    %c0_1 = arith.constant 0 : index
    %c0_2 = arith.constant 0 : index
    %1 = vector.load %arg2[%c0_1, %c0_2] : memref<128x384xf32, #tpu.memory_space<vmem>>, vector<128x384xf32>
    %cst = arith.constant dense<0.000000e+00> : vector<8x384xf32>
    %2 = tpu.matmul %0, %1, %cst {dimension_numbers = #tpu.dot_dimension_numbers<[1], [0], [0], [1], [0, 0, 1, 1], [], []>} : vector<8x128xf32>, vector<128x384xf32>, vector<8x384xf32> -> vector<8x384xf32>
    %c0_3 = arith.constant 0 : index
    %c0_4 = arith.constant 0 : index
    %3 = vector.load %arg3[%c0_3, %c0_4] : memref<1x384xf32, #tpu.memory_space<vmem>>, vector<1x384xf32>
    %4 = vector.broadcast %3 : vector<1x384xf32> to vector<8x384xf32>
    %5 = arith.addf %2, %4 : vector<8x384xf32>
    %c0_5 = arith.constant 0 : index
    %c0_6 = arith.constant 0 : index
    %6 = vector.load %arg4[%c0_5, %c0_6] : memref<8x384xf32, #tpu.memory_space<vmem>>, vector<8x384xf32>
    tpu.vector_store %arg4[%c0_5, %c0_6], %5 {strides = array<i32>} : memref<8x384xf32, #tpu.memory_space<vmem>>, vector<8x384xf32>,
    return
  }
  func.func @transform_0(%arg0: i32) -> (i32, i32) {
    %c0_i32 = arith.constant 0 : i32
    %c0_i32_0 = arith.constant 0 : i32
    return %arg0, %c0_i32 : i32, i32
  }
  func.func @transform_1(%arg0: i32) -> (i32, i32) {
    %c0_i32 = arith.constant 0 : i32
    %c0_i32_0 = arith.constant 0 : i32
    %c0_i32_1 = arith.constant 0 : i32
    return %c0_i32, %c0_i32_0 : i32, i32
  }
  func.func @transform_2(%arg0: i32) -> (i32, i32) {
    %c0_i32 = arith.constant 0 : i32
    %c0_i32_0 = arith.constant 0 : i32
    %c0_i32_1 = arith.constant 0 : i32
    return %c0_i32, %c0_i32_0 : i32, i32
  }
  func.func @transform_3(%arg0: i32) -> (i32, i32) {
    %c0_i32 = arith.constant 0 : i32
    %c0_i32_0 = arith.constant 0 : i32
    return %arg0, %c0_i32 : i32, i32
  }
}

module attributes {stable_mosaic.version = 11 : i64} {
  func.func @_ffn_norm_kernel(%arg0: i32, %arg1: memref<8x128xf32, #tpu.memory_space<vmem>>, %arg2: memref<128x128xf32, #tpu.memory_space<vmem>>, %arg3: memref<1x128xf32, #tpu.memory_space<vmem>>, %arg4: memref<128x128xf32, #tpu.memory_space<vmem>>, %arg5: memref<1x128xf32, #tpu.memory_space<vmem>>, %arg6: memref<1x128xf32, #tpu.memory_space<vmem>>, %arg7: memref<1x128xf32, #tpu.memory_space<vmem>>, %arg8: memref<8x128xf32, #tpu.memory_space<vmem>>) attributes {dimension_semantics = [#tpu.dimension_semantics<parallel>], iteration_bounds = array<i64: 2>, scalar_prefetch = 0 : i64, scratch_operands = 0 : i64, tpu.core_type = #tpu.core_type<tc>, window_params = [{transform_indices = @transform_0, window_bounds = array<i64: 8, 128>}, {pipeline_mode = #tpu.pipeline_mode<synchronous>, transform_indices = @transform_1, window_bounds = array<i64: 128, 128>}, {pipeline_mode = #tpu.pipeline_mode<synchronous>, transform_indices = @transform_2, window_bounds = array<i64: 1, 128>}, {pipeline_mode = #tpu.pipeline_mode<synchronous>, transform_indices = @transform_3, window_bounds = array<i64: 128, 128>}, {pipeline_mode = #tpu.pipeline_mode<synchronous>, transform_indices = @transform_4, window_bounds = array<i64: 1, 128>}, {pipeline_mode = #tpu.pipeline_mode<synchronous>, transform_indices = @transform_5, window_bounds = array<i64: 1, 128>}, {pipeline_mode = #tpu.pipeline_mode<synchronous>, transform_indices = @transform_6, window_bounds = array<i64: 1, 128>}, {transform_indices = @transform_7, window_bounds = array<i64: 8, 128>}]} {
    %c0 = arith.constant 0 : index
    %c0_0 = arith.constant 0 : index
    %0 = vector.load %arg1[%c0, %c0_0] : memref<8x128xf32, #tpu.memory_space<vmem>>, vector<8x128xf32>
    %c0_1 = arith.constant 0 : index
    %c0_2 = arith.constant 0 : index
    %1 = vector.load %arg2[%c0_1, %c0_2] : memref<128x128xf32, #tpu.memory_space<vmem>>, vector<128x128xf32>
    %cst = arith.constant dense<0.000000e+00> : vector<8x128xf32>
    %2 = tpu.matmul %0, %1, %cst {dimension_numbers = #tpu.dot_dimension_numbers<[1], [0], [0], [1], [0, 0, 1, 1], [], []>} : vector<8x128xf32>, vector<128x128xf32>, vector<8x128xf32> -> vector<8x128xf32>
    %c0_3 = arith.constant 0 : index
    %c0_4 = arith.constant 0 : index
    %3 = vector.load %arg3[%c0_3, %c0_4] : memref<1x128xf32, #tpu.memory_space<vmem>>, vector<1x128xf32>
    %4 = vector.broadcast %3 : vector<1x128xf32> to vector<8x128xf32>
    %5 = arith.addf %2, %4 : vector<8x128xf32>
    %cst_5 = arith.constant 0.000000e+00 : f32
    %6 = vector.broadcast %cst_5 : f32 to vector<8x128xf32>
    %7 = arith.maximumf %5, %6 : vector<8x128xf32>
    %c0_6 = arith.constant 0 : index
    %c0_7 = arith.constant 0 : index
    %8 = vector.load %arg4[%c0_6, %c0_7] : memref<128x128xf32, #tpu.memory_space<vmem>>, vector<128x128xf32>
    %cst_8 = arith.constant dense<0.000000e+00> : vector<8x128xf32>
    %9 = tpu.matmul %7, %8, %cst_8 {dimension_numbers = #tpu.dot_dimension_numbers<[1], [0], [0], [1], [0, 0, 1, 1], [], []>} : vector<8x128xf32>, vector<128x128xf32>, vector<8x128xf32> -> vector<8x128xf32>
    %c0_9 = arith.constant 0 : index
    %c0_10 = arith.constant 0 : index
    %10 = vector.load %arg5[%c0_9, %c0_10] : memref<1x128xf32, #tpu.memory_space<vmem>>, vector<1x128xf32>
    %11 = vector.broadcast %10 : vector<1x128xf32> to vector<8x128xf32>
    %12 = arith.addf %9, %11 : vector<8x128xf32>
    %c0_11 = arith.constant 0 : index
    %c0_12 = arith.constant 0 : index
    %13 = vector.load %arg6[%c0_11, %c0_12] : memref<1x128xf32, #tpu.memory_space<vmem>>, vector<1x128xf32>
    %c0_13 = arith.constant 0 : index
    %c0_14 = arith.constant 0 : index
    %14 = vector.load %arg7[%c0_13, %c0_14] : memref<1x128xf32, #tpu.memory_space<vmem>>, vector<1x128xf32>
    %15 = arith.addf %12, %0 : vector<8x128xf32>
    %cst_15 = arith.constant dense<0.000000e+00> : vector<8xf32>
    %16 = vector.multi_reduction <add>, %15, %cst_15 [1] : vector<8x128xf32> to vector<8xf32>
    %17 = vector.shape_cast %16 : vector<8xf32> to vector<8x1xf32>
    %cst_16 = arith.constant 1.280000e+02 : f32
    %18 = vector.broadcast %cst_16 : f32 to vector<8x1xf32>
    %19 = arith.divf %17, %18 : vector<8x1xf32>
    %20 = vector.broadcast %19 : vector<8x1xf32> to vector<8x128xf32>
    %21 = arith.subf %15, %20 : vector<8x128xf32>
    %22 = arith.mulf %21, %21 : vector<8x128xf32>
    %cst_17 = arith.constant dense<0.000000e+00> : vector<8xf32>
    %23 = vector.multi_reduction <add>, %22, %cst_17 [1] : vector<8x128xf32> to vector<8xf32>
    %24 = vector.shape_cast %23 : vector<8xf32> to vector<8x1xf32>
    %cst_18 = arith.constant 0.00787401571 : f32
    %25 = vector.broadcast %cst_18 : f32 to vector<8x1xf32>
    %26 = arith.mulf %24, %25 : vector<8x1xf32>
    %27 = math.sqrt %26 : vector<8x1xf32>
    %28 = vector.broadcast %13 : vector<1x128xf32> to vector<8x128xf32>
    %29 = arith.mulf %28, %21 : vector<8x128xf32>
    %cst_19 = arith.constant 2.000000e-01 : f32
    %30 = vector.broadcast %cst_19 : f32 to vector<8x1xf32>
    %31 = arith.addf %27, %30 : vector<8x1xf32>
    %32 = tpu.reciprocal %31 {approx = true} : vector<8x1xf32> -> vector<8x1xf32>
    %33 = arith.mulf %31, %32 : vector<8x1xf32>
    %cst_20 = arith.constant 2.000000e+00 : f32
    %34 = vector.broadcast %cst_20 : f32 to vector<8x1xf32>
    %35 = arith.subf %34, %33 : vector<8x1xf32>
    %36 = arith.mulf %32, %35 : vector<8x1xf32>
    %37 = vector.broadcast %36 : vector<8x1xf32> to vector<8x128xf32>
    %38 = arith.mulf %29, %37 : vector<8x128xf32>
    %39 = vector.broadcast %14 : vector<1x128xf32> to vector<8x128xf32>
    %40 = arith.addf %38, %39 : vector<8x128xf32>
    %c0_21 = arith.constant 0 : index
    %c0_22 = arith.constant 0 : index
    %41 = vector.load %arg8[%c0_21, %c0_22] : memref<8x128xf32, #tpu.memory_space<vmem>>, vector<8x128xf32>
    tpu.vector_store %arg8[%c0_21, %c0_22], %40 {strides = array<i32>} : memref<8x128xf32, #tpu.memory_space<vmem>>, vector<8x128xf32>,
    return
  }
  func.func @transform_0(%arg0: i32) -> (i32, i32) {
    %c0_i32 = arith.constant 0 : i32
    %c0_i32_0 = arith.constant 0 : i32
    return %arg0, %c0_i32 : i32, i32
  }
  func.func @transform_1(%arg0: i32) -> (i32, i32) {
    %c0_i32 = arith.constant 0 : i32
    %c0_i32_0 = arith.constant 0 : i32
    %c0_i32_1 = arith.constant 0 : i32
    return %c0_i32, %c0_i32_0 : i32, i32
  }
  func.func @transform_2(%arg0: i32) -> (i32, i32) {
    %c0_i32 = arith.constant 0 : i32
    %c0_i32_0 = arith.constant 0 : i32
    %c0_i32_1 = arith.constant 0 : i32
    return %c0_i32, %c0_i32_0 : i32, i32
  }
  func.func @transform_3(%arg0: i32) -> (i32, i32) {
    %c0_i32 = arith.constant 0 : i32
    %c0_i32_0 = arith.constant 0 : i32
    %c0_i32_1 = arith.constant 0 : i32
    return %c0_i32, %c0_i32_0 : i32, i32
  }
  func.func @transform_4(%arg0: i32) -> (i32, i32) {
    %c0_i32 = arith.constant 0 : i32
    %c0_i32_0 = arith.constant 0 : i32
    %c0_i32_1 = arith.constant 0 : i32
    return %c0_i32, %c0_i32_0 : i32, i32
  }
  func.func @transform_5(%arg0: i32) -> (i32, i32) {
    %c0_i32 = arith.constant 0 : i32
    %c0_i32_0 = arith.constant 0 : i32
    %c0_i32_1 = arith.constant 0 : i32
    return %c0_i32, %c0_i32_0 : i32, i32
  }
  func.func @transform_6(%arg0: i32) -> (i32, i32) {
    %c0_i32 = arith.constant 0 : i32
    %c0_i32_0 = arith.constant 0 : i32
    %c0_i32_1 = arith.constant 0 : i32
    return %c0_i32, %c0_i32_0 : i32, i32
  }
  func.func @transform_7(%arg0: i32) -> (i32, i32) {
    %c0_i32 = arith.constant 0 : i32
    %c0_i32_0 = arith.constant 0 : i32
    return %arg0, %c0_i32 : i32, i32
  }
}

</mosaic_0001>

<bundles_post_ra>
// kernel: encoder_forward.7
= control target key start
LH: loop header
LB: loop body
LE: loop exit
PB: predicated region body
PF: predicated region fallthrough
CT: control target
= control target key end

     0   :  { %s404_s15 = smov 0   ;;  %s433_s0 = inlined_call_operand.vmem [shape: f32[16,16], index: 0, kind: input, shape index: {}]   ;;  %s434_s1 = inlined_call_operand.vmem [shape: f32[16,128], index: 1, kind: input, shape index: {}]   ;;  %s435_s2 = inlined_call_operand.vmem [shape: f32[1,128], index: 2, kind: input, shape index: {}]   ;;  %s436_s3 = inlined_call_operand.vmem [shape: f32[8,128], index: 3, kind: input, shape index: {}]   ;;  %s437_s4 = inlined_call_operand.vmem [shape: f32[16,128], index: 4, kind: output, shape index: {}]  }
   0x1 LB: > { %s333_s16 = sadd.s32 4294967295, %s374_s15   ;;  %p337_p0 = scmp.ge.s32.totalorder %s374_s15, 1  ;;  %s374_s15 = sphi %s404_s15, %s14_s15  }
   0x2   : > { %p161_p1 = scmp.lt.s32.totalorder %s374_s15, 3 }
   0x4   : > { %p162_p2 = pnand %p337_p0, %p161_p1 }
   0x5   : > { %v194_v0 = vld [vmem:[%s434_s1] sm:$0xff] (!%p162_p2)  ;;  %v195_v1 = vld [vmem:[%s434_s1 + $0x8] sm:$0xff] (!%p162_p2)  ;;  %p185_p3 = scmp.lt.s32.totalorder (!%p162_p2), %s333_s16, 1  ;;  %v376_v2 = vmov (!%p162_p2), 0.0|0.0   ;;  %vm377_vm0 = vmmov (!%p162_p2), 0   ;;  %v378_v4 = vmov (!%p162_p2), 0.0  }
   0x6   : > { %165 = sbr.rel (%p162_p2) target bundleno = 234 (0xea), region = 36  ;;  %354 = vmatprep.subr.bf16.mxu0 (!%p162_p2), %v376_v2  ;;  %v355_v3 = vpack.c.bf16 (!%p162_p2), %v195_v1, %v194_v0  ;;  %351 = vmatprep.mubr.msk.f32.mxu0 (!%p162_p2), %vm377_vm0, %v378_v4  ;;  %vm203_vm1 = vcmask (!%p162_p2), 130048   ;;  %v340_v6 = vld [vmem:[%s435_s2] ss:$0 sm:$0xff] (!%p162_p2) }
   0x7   : > { %v277_v8 = vld [vmem:[%s436_s3] sm:$0xff] (!%p162_p2) }
   0x8   : > { %356 = vmatpush3.bf16.msra.mxu0 (!%p162_p2), %v355_v3 }
   0xd   : > { %s439_s16 = smov (!%p185_p3, %s333_s16), 1 }
   0xe   : > { %s338_s21 = sshll.u32 %s439_s16, 3 }
   0xf   : > { %s188_s24 = scalar_lea.vmem %s433_s0, %s338_s21  ;;  %s192_s5 = scalar_lea.vmem %s437_s4, %s338_s21 }
  0x10   : > { %v193_v5 = vld [vmem:[%s188_s24] sm:$0xff] }
  0x11   : > { %352 = vmatmul.mubr.msk.f32.vlgmr.msra.gmra.mrb[0].mxu0 %vm203_vm1, %v193_v5 }
  0xe4   : > { %v273_v7 = vpop.f32.mrb[0].mxu0 }
  0xe5   : > { %v274_v9 = vadd.f32 %v340_v6, %v273_v7  ;;  %v353_v10 = vpop.f32.mrb[1].mxu0 }
  0xe7   : > { %v278_v11 = vadd.f32 %v277_v8, %v274_v9 }
  0xe9   : > { %279 = vst [vmem:[%s192_s5] sm:$0xff] %v278_v11 }
  0xea PF: > { %s14_s15 = sadd.s32 1, %s374_s15  }
  0xeb   : > { %p11_p4 = scmp.ge.s32.totalorder %s14_s15, 4  }
  0xed   :  { %13 = sbr.rel (!%p11_p4) target bundleno = 1 (0x1), region = 66 }

// kernel: encoder_forward.8
= control target key start
LH: loop header
LB: loop body
LE: loop exit
PB: predicated region body
PF: predicated region fallthrough
CT: control target
= control target key end

     0   :  { %8 = vsyncpa [#allocation3], 0  ;;  %s670_s12 = smov 0   ;;  %s743_s0 = inlined_call_operand.vmem [shape: f32[16,128], index: 0, kind: input, shape index: {}]   ;;  %s744_s1 = inlined_call_operand.hbm [shape: f32[128,384], index: 1, kind: input, shape index: {}]   ;;  %s745_s2 = inlined_call_operand.vmem [shape: f32[1,384], index: 2, kind: input, shape index: {}]   ;;  %s746_s3 = inlined_call_operand.vmem [shape: f32[16,384], index: 3, kind: output, shape index: {}]  }
   0x1 LB: > { %s676_s13 = sadd.s32 4294967295, %s642_s12   ;;  %p462_p0 = scmp.ge.s32.totalorder %s642_s12, 1  ;;  %s642_s12 = sphi %s670_s12, %s14_s12  }
   0x2   : > { %p113_p1 = scmp.lt.s32.totalorder %s642_s12, 3  ;;  %s644_s14 = smov [#allocation2]  }
   0x3   : > { %s125_s15 = sshll.u32 %s644_s14, 4  ;;  %p747_p3 = scmp.eq.s32.totalorder %s676_s13, 0  ;;  %s126_s15 = int_to_ptr.vmem [resolvable:$true] %s125_s15 }
   0x4   : > { %p680_p2 = pnand %p462_p0, %p113_p1  ;;  %s604_s20 = scalar_lea.hbm %s744_s1, 6144 }
   0x5   : > { %p605_p6 = scmp.ne.s32.totalorder %s744_s1, %s604_s20  ;;  %p611_p10 = scmp.lt.u32.totalorder %s604_s20, %s744_s1 }
   0x6   : > { %s749_s16 = scalar_select %p680_p2, 1, 0 }
   0x7   : > { %p584_p4 = pneg %p680_p2 }
   0x9   : > { %p689_p5 = pnand %p747_p3, %p584_p4 }
   0xb   : > { %p606_p7 = pneg %p689_p5 }
   0xd   : > { %p607_p8 = pnand %p606_p7, %p605_p6 }
   0xf   : > { %p608_p9 = pneg %p607_p8 }
  0x11   : > { %p613_p11 = pnand %p611_p10, %p608_p9 }
  0x13   : > { %616 = shalt.err (!%p613_p11)
}
  0x14   : > { %s617_s25 = scalar_lea.vmem %s126_s15, 6144  ;;  %p625_p1 = scmp.lt.s32.totalorder %s126_s15, %s126_s15 }
  0x15   : > { %p618_p12 = scmp.ne.s32.totalorder %s126_s15, %s617_s25  ;;  %p626_p4 = scmp.lt.s32.totalorder %s617_s25, %s617_s25 }
  0x17   : > { %p620_p13 = pnand %p618_p12, %p606_p7  ;;  %p627_p3 = por %p626_p4, %p625_p1 }
  0x19   : > { %p621_p0 = pneg %p620_p13 }
  0x1b   : > { %p628_p2 = pnand %p627_p3, %p621_p0 }
  0x1d   : > { %631 = shalt.err (!%p628_p2)
}
  0x1e   : > { %s645_s26 = smov 384   ;;  %s646_s27 = smov 24  }
  0x1f   : > { %587 = dma.hbm_to_vmem [thread:$0]  (!%p689_p5), %s744_s1, 6144, %s126_s15, [#allocation3], %s645_s26, %s645_s26, %s646_s27  }
  0x20   : > { %p751_p6 = scmp.ne.s32.totalorder %s749_s16, 0 }
  0x21   : > { %p752_p8 = scmp.eq.s32.totalorder (!%p751_p6), %s676_s13, 0 }
  0x22   : > { %151 = sbr.rel (%p751_p6) target bundleno = 293 (0x125), region = 32 }
  0x29   : > { %637 = dma.done.wait (%p752_p8), [#allocation3], 6144   ;;  %p753_p7 = pmov %p752_p8 }
  0x2a   : > { %v647_v0 = vmov 0.0|0.0   ;;  %v648_v1 = vmov 0.0   ;;  %vm649_vm0 = vmmov 0   ;;  %v185_v2 = vld [vmem:[#allocation2 + $0x8] sm:$0xff]  ;;  %v188_v3 = vld [vmem:[#allocation2 + $0x20] sm:$0xff]  ;;  %v187_v6 = vld [vmem:[#allocation2 + $0x18] sm:$0xff] }
  0x2b   : > { %639 = vsyncadd (%p753_p7), [#allocation3], 4294961152  ;;  %555 = vmatprep.subr.bf16.mxu1 %v647_v0  ;;  %313 = vmatprep.mubr.f32.mxu0 %v648_v1  ;;  %v184_v4 = vld [vmem:[#allocation2] sm:$0xff]  ;;  %v523_v5 = vpack.c.bf16 %v188_v3, %v185_v2  ;;  %v186_v7 = vld [vmem:[#allocation2 + $0x10] sm:$0xff]  ;;  %p174_p2 = scmp.lt.s32.totalorder %s676_s13, 1 }
  0x2c   : > { %520 = vmatprep.mubr.msk.f32.mxu1 %vm649_vm0, %v648_v1  ;;  %v189_v8 = vld [vmem:[#allocation2 + $0x28] sm:$0xff]  ;;  %v525_v9 = vpack.c.bf16 %v187_v6, %v184_v4  ;;  %v191_v11 = vld [vmem:[#allocation2 + $0x38] sm:$0xff]  ;;  %v194_v12 = vld [vmem:[#allocation2 + $0x50] sm:$0xff] }
  0x2d   : > { %v556_v10 = vpack.c.bf16 %v189_v8, %v186_v7  ;;  %v190_v13 = vld [vmem:[#allocation2 + $0x30] sm:$0xff]  ;;  %524 = vmatprep.subr.bf16.mxu0 %v523_v5  ;;  %v527_v14 = vpack.c.bf16 %v194_v12, %v191_v11  ;;  %v193_v15 = vld [vmem:[#allocation2 + $0x48] sm:$0xff]  ;;  %v192_v16 = vld [vmem:[#allocation2 + $0x40] sm:$0xff]  ;;  %s755_s13 = smov (!%p174_p2, %s676_s13), 1  ;;  %v234_v12 = vlaneseq }
  0x2e   : > { %v195_v17 = vld [vmem:[#allocation2 + $0x58] sm:$0xff]  ;;  %526 = vmatpush1.bf16.msra.mxu0 %v525_v9  ;;  %v529_v18 = vpack.c.bf16 %v193_v15, %v190_v13  ;;  %v197_v20 = vld [vmem:[#allocation2 + $0x68] sm:$0xff]  ;;  %v200_v21 = vld [vmem:[#allocation2 + $0x80] sm:$0xff]  ;;  %s467_s30 = sshll.u32 %s755_s13, 3  ;;  %s579_s9 = smul.u32 24, %s755_s13 }
  0x2f   : > { %557 = vmatpush3.bf16.msra.mxu1 %v556_v10  ;;  %v559_v19 = vpack.c.bf16 %v195_v17, %v192_v16  ;;  %v196_v22 = vld [vmem:[#allocation2 + $0x60] sm:$0xff]  ;;  %528 = vmatprep.subr.bf16.mxu0 %v527_v14  ;;  %v531_v23 = vpack.c.bf16 %v200_v21, %v197_v20  ;;  %v199_v24 = vld [vmem:[#allocation2 + $0x78] sm:$0xff]  ;;  %v198_v25 = vld [vmem:[#allocation2 + $0x70] sm:$0xff]  ;;  %s177_s6 = scalar_lea.vmem %s743_s0, %s467_s30  ;;  %v235_v13 = vshrl.u32 %v234_v12, 7 }
  0x30   : > { %558 = vmatprep.subr.bf16.mxu1 %v647_v0  ;;  %v201_v26 = vld [vmem:[#allocation2 + $0x88] sm:$0xff]  ;;  %v203_v27 = vld [vmem:[#allocation2 + $0x98] sm:$0xff]  ;;  %v206_v28 = vld [vmem:[#allocation2 + $0xb0] sm:$0xff]  ;;  %v533_v29 = vpack.c.bf16 %v199_v24, %v196_v22  ;;  %s182_s14 = scalar_lea.vmem %s746_s3, %s579_s9 }
  0x31   : > { %v562_v30 = vpack.c.bf16 %v201_v26, %v198_v25  ;;  %v202_v31 = vld [vmem:[#allocation2 + $0x90] sm:$0xff]  ;;  %v535_v32 = vpack.c.bf16 %v206_v28, %v203_v27  ;;  %v205_v33 = vld [vmem:[#allocation2 + $0xa8] sm:$0xff]  ;;  %v204_v34 = vld [vmem:[#allocation2 + $0xa0] sm:$0xff]  ;;  %v236_v14 = vsub.s32 0, %v235_v13  ;;  %v244_v15 = vsub.s32 2, %v235_v13 }
  0x32   : > { %530 = vmatpush1.bf16.msra.mxu0 %v529_v18  ;;  %v207_v35 = vld [vmem:[#allocation2 + $0xb8] sm:$0xff]  ;;  %v209_v36 = vld [vmem:[#allocation2 + $0xc8] sm:$0xff]  ;;  %v212_v37 = vld [vmem:[#allocation2 + $0xe0] sm:$0xff]  ;;  %v537_v38 = vpack.c.bf16 %v205_v33, %v202_v31  ;;  %v240_v17 = vsub.s32 1, %v235_v13 }
  0x33   : > { %560 = vmatpush3.bf16.msra.mxu1 %v559_v19  ;;  %532 = vmatprep.subr.bf16.mxu0 %v531_v23  ;;  %v565_v39 = vpack.c.bf16 %v207_v35, %v204_v34  ;;  %v208_v40 = vld [vmem:[#allocation2 + $0xc0] sm:$0xff]  ;;  %v539_v41 = vpack.c.bf16 %v212_v37, %v209_v36  ;;  %v211_v42 = vld [vmem:[#allocation2 + $0xd8] sm:$0xff]  ;;  %v210_v43 = vld [vmem:[#allocation2 + $0xd0] sm:$0xff] }
  0x34   : > { %561 = vmatprep.subr.bf16.mxu1 %v647_v0  ;;  %v213_v44 = vld [vmem:[#allocation2 + $0xe8] sm:$0xff]  ;;  %v215_v45 = vld [vmem:[#allocation2 + $0xf8] sm:$0xff]  ;;  %v218_v46 = vld [vmem:[#allocation2 + $0x110] sm:$0xff]  ;;  %v541_v47 = vpack.c.bf16 %v211_v42, %v208_v40 }
  0x35   : > { %v568_v48 = vpack.c.bf16 %v213_v44, %v210_v43  ;;  %v214_v49 = vld [vmem:[#allocation2 + $0xf0] sm:$0xff]  ;;  %v543_v50 = vpack.c.bf16 %v218_v46, %v215_v45  ;;  %v217_v51 = vld [vmem:[#allocation2 + $0x108] sm:$0xff]  ;;  %v216_v52 = vld [vmem:[#allocation2 + $0x100] sm:$0xff] }
  0x36   : > { %534 = vmatpush1.bf16.msra.mxu0 %v533_v29  ;;  %v219_v53 = vld [vmem:[#allocation2 + $0x118] sm:$0xff]  ;;  %v221_v54 = vld [vmem:[#allocation2 + $0x128] sm:$0xff]  ;;  %v224_v55 = vld [vmem:[#allocation2 + $0x140] sm:$0xff]  ;;  %v545_v56 = vpack.c.bf16 %v217_v51, %v214_v49 }
  0x37   : > { %563 = vmatpush3.bf16.msra.mxu1 %v562_v30  ;;  %536 = vmatprep.subr.bf16.mxu0 %v535_v32  ;;  %v571_v57 = vpack.c.bf16 %v219_v53, %v216_v52  ;;  %v220_v58 = vld [vmem:[#allocation2 + $0x120] sm:$0xff]  ;;  %v547_v59 = vpack.c.bf16 %v224_v55, %v221_v54  ;;  %v223_v60 = vld [vmem:[#allocation2 + $0x138] sm:$0xff]  ;;  %v222_v61 = vld [vmem:[#allocation2 + $0x130] sm:$0xff] }
  0x38   : > { %564 = vmatprep.subr.bf16.mxu1 %v647_v0  ;;  %v225_v62 = vld [vmem:[#allocation2 + $0x148] sm:$0xff]  ;;  %v227_v63 = vld [vmem:[#allocation2 + $0x158] sm:$0xff]  ;;  %v230_v1 = vld [vmem:[#allocation2 + $0x170] sm:$0xff]  ;;  %v549_v2 = vpack.c.bf16 %v223_v60, %v220_v58 }
  0x39   : > { %v574_v3 = vpack.c.bf16 %v225_v62, %v222_v61  ;;  %v226_v4 = vld [vmem:[#allocation2 + $0x150] sm:$0xff]  ;;  %v551_v5 = vpack.c.bf16 %v230_v1, %v227_v63  ;;  %v229_v6 = vld [vmem:[#allocation2 + $0x168] sm:$0xff]  ;;  %v228_v7 = vld [vmem:[#allocation2 + $0x160] sm:$0xff] }
  0x3a   : > { %538 = vmatpush1.bf16.msra.mxu0 %v537_v38  ;;  %v231_v8 = vld [vmem:[#allocation2 + $0x178] sm:$0xff]  ;;  %v553_v9 = vpack.c.bf16 %v229_v6, %v226_v4  ;;  %v183_v11 = vld [vmem:[%s177_s6] sm:$0xff] }
  0x3b   : > { %566 = vmatpush3.bf16.msra.mxu1 %v565_v39  ;;  %540 = vmatprep.subr.bf16.mxu0 %v539_v41  ;;  %v577_v10 = vpack.c.bf16 %v231_v8, %v228_v7  ;;  %v232_v16 = vld [vmem:[%s745_s2] sm:$0x7] }
  0x3c   : > { %567 = vmatprep.subr.bf16.mxu1 %v647_v0  ;;  %v245_v18 = vrot.slane %v232_v16, %v244_v15  ;;  %v241_v19 = vrot.slane %v232_v16, %v240_v17 }
  0x3e   : > { %542 = vmatpush1.bf16.msra.mxu0 %v541_v47 }
  0x3f   : > { %569 = vmatpush3.bf16.msra.mxu1 %v568_v48  ;;  %544 = vmatprep.subr.bf16.mxu0 %v543_v50 }
  0x40   : > { %570 = vmatprep.subr.bf16.mxu1 %v647_v0 }
  0x42   : > { %546 = vmatpush1.bf16.msra.mxu0 %v545_v56 }
  0x43   : > { %572 = vmatpush3.bf16.msra.mxu1 %v571_v57  ;;  %548 = vmatprep.subr.bf16.mxu0 %v547_v59 }
  0x44   : > { %573 = vmatprep.subr.bf16.mxu1 %v647_v0 }
  0x46   : > { %550 = vmatpush1.bf16.msra.mxu0 %v549_v2 }
  0x47   : > { %575 = vmatpush3.bf16.msra.mxu1 %v574_v3  ;;  %552 = vmatprep.subr.bf16.mxu0 %v551_v5 }
  0x48   : > { %576 = vmatprep.subr.bf16.mxu1 %v647_v0  ;;  %v237_v0 = vrot.slane %v232_v16, %v236_v14 }
  0x4a   : > { %554 = vmatpush1.bf16.msra.mxu0 %v553_v9 }
  0x4b   : > { %578 = vmatpush3.bf16.msra.mxu1 %v577_v10 }
  0x4d   : > { %314 = vmatmul.mubr.f32.vlgmr.msra.gmra.mrb[0].mxu0 %v183_v11 }
  0x4e   : > { %521 = vmatmul.mubr.f32.vlgmr.msra.gmra.mrb[0].mxu1 %v183_v11 }
 0x120   : > { %v315_v20 = vpop.f32.mrb[0].mxu0 }
 0x121   : > { %v386_v21 = vpop.f32.mrb[0].mxu1  ;;  %v316_v22 = vadd.f32 %v315_v20, %v237_v0  ;;  %v317_v24 = vpop.f32.mrb[1].mxu0 }
 0x122   : > { %v387_v23 = vadd.f32 %v386_v21, %v245_v18  ;;  %v522_v25 = vpop.f32.mrb[1].mxu1  ;;  %v318_v26 = vadd.f32 %v317_v24, %v241_v19 }
 0x123   : > { %390 = vst [vmem:[%s182_s14] sm:$0xff] %v316_v22 }
 0x124   : > { %392 = vst [vmem:[%s182_s14 + $0x10] sm:$0xff] %v387_v23  ;;  %391 = vst [vmem:[%s182_s14 + $0x8] sm:$0xff] %v318_v26 }
 0x125 PF: > { %s14_s12 = sadd.s32 1, %s642_s12  }
 0x126   : > { %p11_p3 = scmp.ge.s32.totalorder %s14_s12, 4  }
 0x128   :  { %13 = sbr.rel (!%p11_p3) target bundleno = 1 (0x1), region = 67 }
 0x12f   :  { %414 = vsyncpa [#allocation3], 1 }
 0x130   :  { %416 = vsyncpa [#allocation3 + $0x1], 1 }

// kernel: encoder_forward.11
= control target key start
LH: loop header
LB: loop body
LE: loop exit
PB: predicated region body
PF: predicated region fallthrough
CT: control target
= control target key end

     0   :  { %s593_s12 = smov 0   ;;  %s779_s0 = inlined_call_operand.vmem [shape: f32[16,128], index: 0, kind: input, shape index: {}]   ;;  %s780_s1 = inlined_call_operand.vmem [shape: f32[128,384], index: 1, kind: input, shape index: {}]   ;;  %s781_s2 = inlined_call_operand.vmem [shape: f32[1,384], index: 2, kind: input, shape index: {}]   ;;  %s782_s3 = inlined_call_operand.vmem [shape: f32[16,384], index: 3, kind: output, shape index: {}]  }
   0x1 LB: > { %s433_s13 = sadd.s32 4294967295, %s568_s12   ;;  %p437_p0 = scmp.ge.s32.totalorder %s568_s12, 1  ;;  %s568_s12 = sphi %s593_s12, %s13_s12  }
   0x2   : > { %p136_p1 = scmp.lt.s32.totalorder %s568_s12, 3 }
   0x4   : > { %p137_p2 = pnand %p437_p0, %p136_p1 }
   0x5   : > { %v170_v0 = vld [vmem:[%s780_s1 + $0x8] sm:$0xff] (!%p137_p2)  ;;  %v173_v1 = vld [vmem:[%s780_s1 + $0x20] sm:$0xff] (!%p137_p2)  ;;  %v570_v4 = vmov (!%p137_p2), 0.0|0.0   ;;  %v172_v5 = vld [vmem:[%s780_s1 + $0x18] sm:$0xff] (!%p137_p2)  ;;  %v571_v8 = vmov (!%p137_p2), 0.0   ;;  %vm572_vm0 = vmmov (!%p137_p2), 0  }
   0x6   : > { %140 = sbr.rel (%p137_p2) target bundleno = 256 (0x100), region = 32  ;;  %v169_v2 = vld [vmem:[%s780_s1] sm:$0xff] (!%p137_p2)  ;;  %v494_v3 = vpack.c.bf16 (!%p137_p2), %v173_v1, %v170_v0  ;;  %526 = vmatprep.subr.bf16.mxu1 (!%p137_p2), %v570_v4  ;;  %v171_v6 = vld [vmem:[%s780_s1 + $0x10] sm:$0xff] (!%p137_p2)  ;;  %v174_v7 = vld [vmem:[%s780_s1 + $0x28] sm:$0xff] (!%p137_p2)  ;;  %298 = vmatprep.mubr.f32.mxu0 (!%p137_p2), %v571_v8  ;;  %p722_p3 = scmp.lt.s32.totalorder (!%p137_p2), %s433_s13, 1 }
   0x7   : > { %v496_v9 = vpack.c.bf16 (!%p137_p2), %v172_v5, %v169_v2  ;;  %v527_v10 = vpack.c.bf16 (!%p137_p2), %v174_v7, %v171_v6  ;;  %v176_v11 = vld [vmem:[%s780_s1 + $0x38] sm:$0xff] (!%p137_p2)  ;;  %v179_v12 = vld [vmem:[%s780_s1 + $0x50] sm:$0xff] (!%p137_p2)  ;;  %491 = vmatprep.mubr.msk.f32.mxu1 (!%p137_p2), %vm572_vm0, %v571_v8  ;;  %v178_v15 = vld [vmem:[%s780_s1 + $0x48] sm:$0xff] (!%p137_p2) }
   0x8   : > { %v175_v13 = vld [vmem:[%s780_s1 + $0x30] sm:$0xff] (!%p137_p2)  ;;  %495 = vmatprep.subr.bf16.mxu0 (!%p137_p2), %v494_v3  ;;  %v498_v14 = vpack.c.bf16 (!%p137_p2), %v179_v12, %v176_v11  ;;  %v177_v16 = vld [vmem:[%s780_s1 + $0x40] sm:$0xff] (!%p137_p2)  ;;  %v180_v17 = vld [vmem:[%s780_s1 + $0x58] sm:$0xff] (!%p137_p2)  ;;  %v219_v12 = vlaneseq (!%p137_p2) }
   0x9   : > { %497 = vmatpush1.bf16.msra.mxu0 (!%p137_p2), %v496_v9  ;;  %528 = vmatpush3.bf16.msra.mxu1 (!%p137_p2), %v527_v10  ;;  %v500_v18 = vpack.c.bf16 (!%p137_p2), %v178_v15, %v175_v13  ;;  %v530_v19 = vpack.c.bf16 (!%p137_p2), %v180_v17, %v177_v16  ;;  %v182_v20 = vld [vmem:[%s780_s1 + $0x68] sm:$0xff] (!%p137_p2)  ;;  %v185_v21 = vld [vmem:[%s780_s1 + $0x80] sm:$0xff] (!%p137_p2)  ;;  %v184_v24 = vld [vmem:[%s780_s1 + $0x78] sm:$0xff] (!%p137_p2) }
   0xa   : > { %v181_v22 = vld [vmem:[%s780_s1 + $0x60] sm:$0xff] (!%p137_p2)  ;;  %499 = vmatprep.subr.bf16.mxu0 (!%p137_p2), %v498_v14  ;;  %529 = vmatprep.subr.bf16.mxu1 (!%p137_p2), %v570_v4  ;;  %v502_v23 = vpack.c.bf16 (!%p137_p2), %v185_v21, %v182_v20  ;;  %v183_v25 = vld [vmem:[%s780_s1 + $0x70] sm:$0xff] (!%p137_p2)  ;;  %v186_v26 = vld [vmem:[%s780_s1 + $0x88] sm:$0xff] (!%p137_p2)  ;;  %v220_v13 = vshrl.u32 (!%p137_p2), %v219_v12, 7 }
   0xb   : > { %v188_v27 = vld [vmem:[%s780_s1 + $0x98] sm:$0xff] (!%p137_p2)  ;;  %v191_v28 = vld [vmem:[%s780_s1 + $0xb0] sm:$0xff] (!%p137_p2)  ;;  %v504_v29 = vpack.c.bf16 (!%p137_p2), %v184_v24, %v181_v22  ;;  %v533_v30 = vpack.c.bf16 (!%p137_p2), %v186_v26, %v183_v25  ;;  %v190_v33 = vld [vmem:[%s780_s1 + $0xa8] sm:$0xff] (!%p137_p2) }
   0xc   : > { %v187_v31 = vld [vmem:[%s780_s1 + $0x90] sm:$0xff] (!%p137_p2)  ;;  %v506_v32 = vpack.c.bf16 (!%p137_p2), %v191_v28, %v188_v27  ;;  %v189_v34 = vld [vmem:[%s780_s1 + $0xa0] sm:$0xff] (!%p137_p2)  ;;  %v192_v35 = vld [vmem:[%s780_s1 + $0xb8] sm:$0xff] (!%p137_p2)  ;;  %v221_v14 = vsub.s32 (!%p137_p2), 0, %v220_v13  ;;  %v229_v15 = vsub.s32 (!%p137_p2), 2, %v220_v13  ;;  %v225_v17 = vsub.s32 (!%p137_p2), 1, %v220_v13 }
   0xd   : > { %501 = vmatpush1.bf16.msra.mxu0 %v500_v18  ;;  %531 = vmatpush3.bf16.msra.mxu1 %v530_v19  ;;  %v194_v36 = vld [vmem:[%s780_s1 + $0xc8] sm:$0xff]  ;;  %v197_v37 = vld [vmem:[%s780_s1 + $0xe0] sm:$0xff]  ;;  %v508_v38 = vpack.c.bf16 %v190_v33, %v187_v31  ;;  %v536_v39 = vpack.c.bf16 %v192_v35, %v189_v34  ;;  %v196_v42 = vld [vmem:[%s780_s1 + $0xd8] sm:$0xff]  ;;  %s785_s13 = smov (!%p722_p3, %s433_s13), 1 }
   0xe   : > { %503 = vmatprep.subr.bf16.mxu0 %v502_v23  ;;  %532 = vmatprep.subr.bf16.mxu1 %v570_v4  ;;  %v193_v40 = vld [vmem:[%s780_s1 + $0xc0] sm:$0xff]  ;;  %v510_v41 = vpack.c.bf16 %v197_v37, %v194_v36  ;;  %v195_v43 = vld [vmem:[%s780_s1 + $0xd0] sm:$0xff]  ;;  %v198_v44 = vld [vmem:[%s780_s1 + $0xe8] sm:$0xff]  ;;  %s438_s9 = sshll.u32 %s785_s13, 3  ;;  %s550_s17 = smul.u32 24, %s785_s13 }
   0xf   : > { %v200_v45 = vld [vmem:[%s780_s1 + $0xf8] sm:$0xff]  ;;  %v203_v46 = vld [vmem:[%s780_s1 + $0x110] sm:$0xff]  ;;  %v512_v47 = vpack.c.bf16 %v196_v42, %v193_v40  ;;  %v539_v48 = vpack.c.bf16 %v198_v44, %v195_v43  ;;  %v202_v51 = vld [vmem:[%s780_s1 + $0x108] sm:$0xff]  ;;  %s162_s14 = scalar_lea.vmem %s779_s0, %s438_s9 }
  0x10   : > { %v199_v49 = vld [vmem:[%s780_s1 + $0xf0] sm:$0xff]  ;;  %v514_v50 = vpack.c.bf16 %v203_v46, %v200_v45  ;;  %v201_v52 = vld [vmem:[%s780_s1 + $0x100] sm:$0xff]  ;;  %v204_v53 = vld [vmem:[%s780_s1 + $0x118] sm:$0xff]  ;;  %s167_s20 = scalar_lea.vmem %s782_s3, %s550_s17 }
  0x11   : > { %505 = vmatpush1.bf16.msra.mxu0 %v504_v29  ;;  %534 = vmatpush3.bf16.msra.mxu1 %v533_v30  ;;  %v206_v54 = vld [vmem:[%s780_s1 + $0x128] sm:$0xff]  ;;  %v209_v55 = vld [vmem:[%s780_s1 + $0x140] sm:$0xff]  ;;  %v516_v56 = vpack.c.bf16 %v202_v51, %v199_v49  ;;  %v542_v57 = vpack.c.bf16 %v204_v53, %v201_v52  ;;  %v208_v60 = vld [vmem:[%s780_s1 + $0x138] sm:$0xff] }
  0x12   : > { %507 = vmatprep.subr.bf16.mxu0 %v506_v32  ;;  %535 = vmatprep.subr.bf16.mxu1 %v570_v4  ;;  %v205_v58 = vld [vmem:[%s780_s1 + $0x120] sm:$0xff]  ;;  %v518_v59 = vpack.c.bf16 %v209_v55, %v206_v54  ;;  %v207_v61 = vld [vmem:[%s780_s1 + $0x130] sm:$0xff]  ;;  %v210_v62 = vld [vmem:[%s780_s1 + $0x148] sm:$0xff] }
  0x13   : > { %v212_v63 = vld [vmem:[%s780_s1 + $0x158] sm:$0xff]  ;;  %v215_v0 = vld [vmem:[%s780_s1 + $0x170] sm:$0xff]  ;;  %v520_v1 = vpack.c.bf16 %v208_v60, %v205_v58  ;;  %v545_v2 = vpack.c.bf16 %v210_v62, %v207_v61  ;;  %v214_v6 = vld [vmem:[%s780_s1 + $0x168] sm:$0xff] }
  0x14   : > { %v211_v3 = vld [vmem:[%s780_s1 + $0x150] sm:$0xff]  ;;  %v522_v5 = vpack.c.bf16 %v215_v0, %v212_v63  ;;  %v213_v7 = vld [vmem:[%s780_s1 + $0x160] sm:$0xff]  ;;  %v216_v8 = vld [vmem:[%s780_s1 + $0x178] sm:$0xff] }
  0x15   : > { %509 = vmatpush1.bf16.msra.mxu0 %v508_v38  ;;  %537 = vmatpush3.bf16.msra.mxu1 %v536_v39  ;;  %v524_v9 = vpack.c.bf16 %v214_v6, %v211_v3  ;;  %v548_v10 = vpack.c.bf16 %v216_v8, %v213_v7  ;;  %v168_v11 = vld [vmem:[%s162_s14] sm:$0xff] }
  0x16   : > { %511 = vmatprep.subr.bf16.mxu0 %v510_v41  ;;  %538 = vmatprep.subr.bf16.mxu1 %v570_v4  ;;  %v217_v16 = vld [vmem:[%s781_s2] sm:$0x7] }
  0x17   : > { %v230_v18 = vrot.slane %v217_v16, %v229_v15  ;;  %v226_v19 = vrot.slane %v217_v16, %v225_v17 }
  0x19   : > { %513 = vmatpush1.bf16.msra.mxu0 %v512_v47  ;;  %540 = vmatpush3.bf16.msra.mxu1 %v539_v48 }
  0x1a   : > { %515 = vmatprep.subr.bf16.mxu0 %v514_v50  ;;  %541 = vmatprep.subr.bf16.mxu1 %v570_v4 }
  0x1d   : > { %517 = vmatpush1.bf16.msra.mxu0 %v516_v56  ;;  %543 = vmatpush3.bf16.msra.mxu1 %v542_v57 }
  0x1e   : > { %519 = vmatprep.subr.bf16.mxu0 %v518_v59  ;;  %544 = vmatprep.subr.bf16.mxu1 %v570_v4 }
  0x21   : > { %521 = vmatpush1.bf16.msra.mxu0 %v520_v1  ;;  %546 = vmatpush3.bf16.msra.mxu1 %v545_v2 }
  0x22   : > { %523 = vmatprep.subr.bf16.mxu0 %v522_v5  ;;  %547 = vmatprep.subr.bf16.mxu1 %v570_v4  ;;  %v222_v4 = vrot.slane %v217_v16, %v221_v14 }
  0x25   : > { %525 = vmatpush1.bf16.msra.mxu0 %v524_v9  ;;  %549 = vmatpush3.bf16.msra.mxu1 %v548_v10 }
  0x28   : > { %299 = vmatmul.mubr.f32.vlgmr.msra.gmra.mrb[0].mxu0 %v168_v11  ;;  %492 = vmatmul.mubr.f32.vlgmr.msra.gmra.mrb[0].mxu1 %v168_v11 }
  0xfb   : > { %v300_v20 = vpop.f32.mrb[0].mxu0  ;;  %v371_v21 = vpop.f32.mrb[0].mxu1 }
  0xfc   : > { %v301_v22 = vadd.f32 %v300_v20, %v222_v4  ;;  %v372_v23 = vadd.f32 %v371_v21, %v230_v18  ;;  %v302_v24 = vpop.f32.mrb[1].mxu0  ;;  %v493_v25 = vpop.f32.mrb[1].mxu1 }
  0xfd   : > { %v303_v26 = vadd.f32 %v302_v24, %v226_v19 }
  0xfe   : > { %375 = vst [vmem:[%s167_s20] sm:$0xff] %v301_v22  ;;  %377 = vst [vmem:[%s167_s20 + $0x10] sm:$0xff] %v372_v23 }
  0xff   : > { %376 = vst [vmem:[%s167_s20 + $0x8] sm:$0xff] %v303_v26 }
 0x100 PF: > { %s13_s12 = sadd.s32 1, %s568_s12  }
 0x101   : > { %p10_p4 = scmp.ge.s32.totalorder %s13_s12, 4  }
 0x103   :  { %12 = sbr.rel (!%p10_p4) target bundleno = 1 (0x1), region = 62 }

// kernel: encoder_forward.10
= control target key start
LH: loop header
LB: loop body
LE: loop exit
PB: predicated region body
PF: predicated region fallthrough
CT: control target
= control target key end

     0   :  { %s786_s24 = smov 0   ;;  %s938_s0 = inlined_call_operand.vmem [shape: f32[16,128], index: 0, kind: input, shape index: {}]   ;;  %s939_s1 = inlined_call_operand.vmem [shape: f32[128,128], index: 1, kind: input, shape index: {}]   ;;  %s940_s2 = inlined_call_operand.vmem [shape: f32[1,128], index: 2, kind: input, shape index: {}]   ;;  %s941_s3 = inlined_call_operand.vmem [shape: f32[128,128], index: 3, kind: input, shape index: {}]   ;;  %s942_s4 = inlined_call_operand.vmem [shape: f32[1,128], index: 4, kind: input, shape index: {}]   ;;  %s943_s5 = inlined_call_operand.vmem [shape: f32[1,128], index: 5, kind: input, shape index: {}]   ;;  %s944_s6 = inlined_call_operand.vmem [shape: f32[1,128], index: 6, kind: input, shape index: {}]   ;;  %s945_s7 = inlined_call_operand.vmem [shape: f32[16,128], index: 7, kind: output, shape index: {}]  }
   0x1 LB: > { %s555_s25 = sadd.s32 4294967295, %s741_s24   ;;  %p559_p0 = scmp.ge.s32.totalorder %s741_s24, 1  ;;  %s741_s24 = sphi %s786_s24, %s17_s24  }
   0x2   : > { %p236_p1 = scmp.lt.s32.totalorder %s741_s24, 3 }
   0x4   : > { %p237_p2 = pnand %p559_p0, %p236_p1 }
   0x5   : > { %v275_v0 = vld [vmem:[%s939_s1] sm:$0xff] (!%p237_p2)  ;;  %v276_v1 = vld [vmem:[%s939_s1 + $0x8] sm:$0xff] (!%p237_p2)  ;;  %v277_v2 = vld [vmem:[%s939_s1 + $0x10] sm:$0xff] (!%p237_p2)  ;;  %v743_v3 = vmov (!%p237_p2), 0.0|0.0   ;;  %vm744_vm0 = vmmov (!%p237_p2), 0   ;;  %v745_v6 = vmov (!%p237_p2), 0.0  }
   0x6   : > { %240 = sbr.rel (%p237_p2) target bundleno = 802 (0x322), region = 48  ;;  %672 = vmatprep.subr.bf16.mxu0 (!%p237_p2), %v743_v3  ;;  %v673_v4 = vpack.c.bf16 (!%p237_p2), %v276_v1, %v275_v0  ;;  %v278_v5 = vld [vmem:[%s939_s1 + $0x18] sm:$0xff] (!%p237_p2)  ;;  %634 = vmatprep.mubr.msk.f32.mxu0 (!%p237_p2), %vm744_vm0, %v745_v6  ;;  %v279_v8 = vld [vmem:[%s939_s1 + $0x20] sm:$0xff] (!%p237_p2)  ;;  %v280_v9 = vld [vmem:[%s939_s1 + $0x28] sm:$0xff] (!%p237_p2)  ;;  %p266_p3 = scmp.lt.s32.totalorder (!%p237_p2), %s555_s25, 1 }
   0x7   : > { %696 = vmatprep.subr.bf16.mxu1 (!%p237_p2), %v743_v3  ;;  %669 = vmatprep.mubr.msk.f32.mxu1 (!%p237_p2), %vm744_vm0, %v745_v6  ;;  %v676_v7 = vpack.c.bf16 (!%p237_p2), %v278_v5, %v277_v2  ;;  %v369_v10 = vld [vmem:[%s941_s3] sm:$0xff] (!%p237_p2)  ;;  %v370_v11 = vld [vmem:[%s941_s3 + $0x8] sm:$0xff] (!%p237_p2)  ;;  %v371_v13 = vld [vmem:[%s941_s3 + $0x10] sm:$0xff] (!%p237_p2)  ;;  %v679_v15 = vpack.c.bf16 (!%p237_p2), %v280_v9, %v279_v8 }
   0x8   : > { %674 = vmatpush3.bf16.msra.mxu0 (!%p237_p2), %v673_v4  ;;  %v697_v12 = vpack.c.bf16 (!%p237_p2), %v370_v11, %v369_v10  ;;  %v372_v14 = vld [vmem:[%s941_s3 + $0x18] sm:$0xff] (!%p237_p2)  ;;  %v281_v16 = vld [vmem:[%s939_s1 + $0x30] sm:$0xff] (!%p237_p2)  ;;  %v373_v19 = vld [vmem:[%s941_s3 + $0x20] sm:$0xff] (!%p237_p2) }
   0x9   : > { %675 = vmatprep.subr.bf16.mxu0 (!%p237_p2), %v743_v3  ;;  %v282_v17 = vld [vmem:[%s939_s1 + $0x38] sm:$0xff] (!%p237_p2)  ;;  %v700_v18 = vpack.c.bf16 (!%p237_p2), %v372_v14, %v371_v13  ;;  %v374_v20 = vld [vmem:[%s941_s3 + $0x28] sm:$0xff] (!%p237_p2)  ;;  %v283_v22 = vld [vmem:[%s939_s1 + $0x40] sm:$0xff] (!%p237_p2) }
   0xa   : > { %698 = vmatpush3.bf16.msra.mxu1 (!%p237_p2), %v697_v12  ;;  %v682_v21 = vpack.c.bf16 (!%p237_p2), %v282_v17, %v281_v16  ;;  %v284_v23 = vld [vmem:[%s939_s1 + $0x48] sm:$0xff] (!%p237_p2)  ;;  %v703_v24 = vpack.c.bf16 (!%p237_p2), %v374_v20, %v373_v19  ;;  %v375_v25 = vld [vmem:[%s941_s3 + $0x30] sm:$0xff] (!%p237_p2)  ;;  %v376_v26 = vld [vmem:[%s941_s3 + $0x38] sm:$0xff] (!%p237_p2) }
   0xb   : > { %699 = vmatprep.subr.bf16.mxu1 (!%p237_p2), %v743_v3  ;;  %v685_v27 = vpack.c.bf16 (!%p237_p2), %v284_v23, %v283_v22  ;;  %v285_v28 = vld [vmem:[%s939_s1 + $0x50] sm:$0xff] (!%p237_p2)  ;;  %v286_v29 = vld [vmem:[%s939_s1 + $0x58] sm:$0xff] (!%p237_p2)  ;;  %v706_v30 = vpack.c.bf16 (!%p237_p2), %v376_v26, %v375_v25  ;;  %v377_v31 = vld [vmem:[%s941_s3 + $0x40] sm:$0xff] (!%p237_p2) }
   0xc   : > { %677 = vmatpush3.bf16.msra.mxu0 (!%p237_p2), %v676_v7  ;;  %v378_v32 = vld [vmem:[%s941_s3 + $0x48] sm:$0xff] (!%p237_p2)  ;;  %v688_v33 = vpack.c.bf16 (!%p237_p2), %v286_v29, %v285_v28  ;;  %v287_v34 = vld [vmem:[%s939_s1 + $0x60] sm:$0xff] (!%p237_p2)  ;;  %v379_v37 = vld [vmem:[%s941_s3 + $0x50] sm:$0xff] (!%p237_p2) }
   0xd   : > { %678 = vmatprep.subr.bf16.mxu0 %v743_v3  ;;  %v288_v35 = vld [vmem:[%s939_s1 + $0x68] sm:$0xff]  ;;  %v709_v36 = vpack.c.bf16 %v378_v32, %v377_v31  ;;  %s947_s25 = smov (!%p266_p3, %s555_s25), 1  ;;  %v380_v38 = vld [vmem:[%s941_s3 + $0x58] sm:$0xff]  ;;  %v289_v40 = vld [vmem:[%s939_s1 + $0x70] sm:$0xff] }
   0xe   : > { %701 = vmatpush3.bf16.msra.mxu1 %v700_v18  ;;  %v691_v39 = vpack.c.bf16 %v288_v35, %v287_v34  ;;  %v290_v41 = vld [vmem:[%s939_s1 + $0x78] sm:$0xff]  ;;  %v712_v42 = vpack.c.bf16 %v380_v38, %v379_v37  ;;  %s560_s17 = sshll.u32 %s947_s25, 3  ;;  %v381_v43 = vld [vmem:[%s941_s3 + $0x60] sm:$0xff]  ;;  %v382_v44 = vld [vmem:[%s941_s3 + $0x68] sm:$0xff] }
   0xf   : > { %702 = vmatprep.subr.bf16.mxu1 %v743_v3  ;;  %v694_v45 = vpack.c.bf16 %v290_v41, %v289_v40  ;;  %s269_s26 = scalar_lea.vmem %s938_s0, %s560_s17  ;;  %v715_v46 = vpack.c.bf16 %v382_v44, %v381_v43  ;;  %v383_v48 = vld [vmem:[%s941_s3 + $0x70] sm:$0xff]  ;;  %v384_v49 = vld [vmem:[%s941_s3 + $0x78] sm:$0xff]  ;;  %v562_v51 = vld [vmem:[%s940_s2] ss:$0 sm:$0xff]  ;;  %s273_s19 = scalar_lea.vmem %s945_s7, %s560_s17 }
  0x10   : > { %680 = vmatpush3.bf16.msra.mxu0 %v679_v15  ;;  %v274_v47 = vld [vmem:[%s269_s26] sm:$0xff]  ;;  %v718_v50 = vpack.c.bf16 %v384_v49, %v383_v48 }
  0x11   : > { %681 = vmatprep.subr.bf16.mxu0 %v743_v3  ;;  %v563_v56 = vld [vmem:[%s942_s4] ss:$0 sm:$0xff] }
  0x12   : > { %704 = vmatpush3.bf16.msra.mxu1 %v703_v24  ;;  %v564_v11 = vld [vmem:[%s943_s5] ss:$0 sm:$0xff] }
  0x13   : > { %705 = vmatprep.subr.bf16.mxu1 %v743_v3  ;;  %v565_v15 = vld [vmem:[%s944_s6] ss:$0 sm:$0xff] }
  0x14   : > { %683 = vmatpush3.bf16.msra.mxu0 %v682_v21 }
  0x15   : > { %684 = vmatprep.subr.bf16.mxu0 %v743_v3 }
  0x16   : > { %707 = vmatpush3.bf16.msra.mxu1 %v706_v30 }
  0x17   : > { %708 = vmatprep.subr.bf16.mxu1 %v743_v3 }
  0x18   : > { %686 = vmatpush3.bf16.msra.mxu0 %v685_v27 }
  0x19   : > { %687 = vmatprep.subr.bf16.mxu0 %v743_v3 }
  0x1a   : > { %710 = vmatpush3.bf16.msra.mxu1 %v709_v36 }
  0x1b   : > { %711 = vmatprep.subr.bf16.mxu1 %v743_v3 }
  0x1c   : > { %689 = vmatpush3.bf16.msra.mxu0 %v688_v33 }
  0x1d   : > { %690 = vmatprep.subr.bf16.mxu0 %v743_v3 }
  0x1e   : > { %713 = vmatpush3.bf16.msra.mxu1 %v712_v42 }
  0x1f   : > { %714 = vmatprep.subr.bf16.mxu1 %v743_v3 }
  0x20   : > { %692 = vmatpush3.bf16.msra.mxu0 %v691_v39 }
  0x21   : > { %693 = vmatprep.subr.bf16.mxu0 %v743_v3 }
  0x22   : > { %716 = vmatpush3.bf16.msra.mxu1 %v715_v46 }
  0x23   : > { %717 = vmatprep.subr.bf16.mxu1 %v743_v3 }
  0x24   : > { %695 = vmatpush3.bf16.msra.mxu0 %v694_v45 }
  0x26   : > { %719 = vmatpush3.bf16.msra.mxu1 %v718_v50 }
  0x27   : > { %635 = vmatmul.mubr.f32.vlgmr.msra.gmra.mrb[0].mxu0 %v274_v47 }
  0xfa   : > { %v364_v52 = vpop.f32.mrb[0].mxu0 }
  0xfb   : > { %v365_v53 = vadd.f32 %v562_v51, %v364_v52  ;;  %v636_v54 = vpop.f32.mrb[1].mxu0 }
  0xfd   : > { %v368_v55 = vmax.f32 %v365_v53, 0.0 }
  0xff   : > { %670 = vmatmul.mubr.f32.vlgmr.msra.gmra.mrb[0].mxu1 %v368_v55 }
 0x1d2   : > { %v458_v57 = vpop.f32.mrb[0].mxu1 }
 0x1d3   : > { %v459_v58 = vadd.f32 %v563_v56, %v458_v57  ;;  %v671_v59 = vpop.f32.mrb[1].mxu1 }
 0x1d5   : > { %v464_v60 = vadd.f32 %v459_v58, %v274_v47 }
 0x1d7   : > { %465 = vadd.xlane.f32.xlu0 %v464_v60 }
 0x264   : > { %v466_v61 = vpop.xlane.xlu0 %465 }
 0x265   : > { %v468_v62 = vmul.f32 0.0078125, %v466_v61 }
 0x267   : > { %v469_v63 = vsub.f32 %v464_v60, %v468_v62 }
 0x269   : > { %v470_v0 = vmul.f32 %v469_v63, %v469_v63  ;;  %v487_v13 = vmul.f32 %v564_v11, %v469_v63 }
 0x26b   : > { %471 = vadd.xlane.f32.xlu0 %v470_v0 }
 0x2f8   : > { %v472_v1 = vpop.xlane.xlu0 %471 }
 0x2f9   : > { %v473_v2 = vmul.f32 0.007874016, %v472_v1 }
 0x2fb   : > { %731 = vrsqrt.f32 %v473_v2  ;;  %vm476_vm1 = vcmp.eq.f32.partialorder %v473_v2, inf  ;;  %v479_v5 = vand.u32 2147483648, %v473_v2  ;;  %vm478_vm2 = vcmp.eq.f32.partialorder %v473_v2, 0.0 }
 0x305   : > { %v732_v3 = vpop.eup %731 }
 0x306   : > { %v475_v4 = vmul.f32 %v732_v3, %v473_v2 }
 0x308   : > { %v477_v6 = vsel %vm476_vm1, %v473_v2, %v475_v4 }
 0x309   : > { %v480_v7 = vsel %vm478_vm2, %v479_v5, %v477_v6 }
 0x30a   : > { %v488_v8 = vadd.f32 0.2, %v480_v7 }
 0x30c   : > { %733 = vrcp.f32 %v488_v8 }
 0x316   : > { %v734_v9 = vpop.eup %733 }
 0x317   : > { %v490_v10 = vmul.f32 %v734_v9, %v488_v8 }
 0x319   : > { %v491_v12 = vsub.f32 2.0, %v490_v10 }
 0x31b   : > { %v492_v14 = vmul.f32 %v734_v9, %v491_v12 }
 0x31d   : > { %v493_v16 = vmul.f32 %v492_v14, %v487_v13 }
 0x31f   : > { %v500_v17 = vadd.f32 %v565_v15, %v493_v16 }
 0x321   : > { %501 = vst [vmem:[%s273_s19] sm:$0xff] %v500_v17 }
 0x322 PF: > { %s17_s24 = sadd.s32 1, %s741_s24  }
 0x323   : > { %p14_p4 = scmp.ge.s32.totalorder %s17_s24, 4  }
 0x325   :  { %16 = sbr.rel (!%p14_p4) target bundleno = 1 (0x1), region = 78 }

// kernel: encoder_forward.9
= control target key start
LH: loop header
LB: loop body
LE: loop exit
PB: predicated region body
PF: predicated region fallthrough
CT: control target
= control target key end

     0   :  { %s2193_s21 = smov 0   ;;  %s2445_s0 = inlined_call_operand.vmem [shape: f32[16,384], index: 0, kind: input, shape index: {}]   ;;  %s2446_s1 = inlined_call_operand.vmem [shape: f32[128,128], index: 1, kind: input, shape index: {}]   ;;  %s2447_s2 = inlined_call_operand.vmem [shape: f32[1,128], index: 2, kind: input, shape index: {}]   ;;  %s2448_s3 = inlined_call_operand.vmem [shape: f32[16,128], index: 3, kind: input, shape index: {}]   ;;  %s2449_s4 = inlined_call_operand.vmem [shape: f32[1,128], index: 4, kind: input, shape index: {}]   ;;  %s2450_s5 = inlined_call_operand.vmem [shape: f32[1,128], index: 5, kind: input, shape index: {}]   ;;  %s2451_s6 = inlined_call_operand.vmem [shape: f32[16,128], index: 6, kind: output, shape index: {}]  }
   0x1 LB: > { %s1860_s22 = sadd.s32 4294967295, %s2146_s21   ;;  %p1864_p0 = scmp.ge.s32.totalorder %s2146_s21, 1  ;;  %s2146_s21 = sphi %s2193_s21, %s16_s21  }
   0x2   : > { %p221_p1 = scmp.lt.s32.totalorder %s2146_s21, 3 }
   0x4   : > { %p222_p2 = pnand %p1864_p0, %p221_p1 }
   0x5   : > { %p254_p3 = scmp.lt.s32.totalorder (!%p222_p2), %s1860_s22, 1  ;;  %v2148_v0 = vmov (!%p222_p2), 0.0   ;;  %vm2149_vm0 = vmmov (!%p222_p2), 0   ;;  %vm270_vm1 = vcmask (!%p222_p2), 130048   ;;  %vm348_vm2 = vcmask (!%p222_p2), 64512   ;;  %s2150_s27 = smov (!%p222_p2), 112  }
   0x6   : > { %225 = sbr.rel (%p222_p2) target bundleno = 3064 (0xbf8), region = 44  ;;  %1946 = vmatprep.subr.mxu0 (!%p222_p2), %v2148_v0  ;;  %1948 = vmatprep.mubr.msk.f32.mxu0 (!%p222_p2), %vm2149_vm0, %v2148_v0  ;;  %s2151_s28 = smov (!%p222_p2), 96   ;;  %vm1649_vm3 = vcmask (!%p222_p2), 261120   ;;  %vm1651_vm4 = vcmask (!%p222_p2), 392192   ;;  %vm1653_vm5 = vcmask (!%p222_p2), 523264   ;;  %vm1655_vm6 = vcmask (!%p222_p2), 654336  }
   0x7   : > { %1986 = vmatprep.subr.mxu1 (!%p222_p2), %v2148_v0  ;;  %1988 = vmatprep.mubr.msk.f32.mxu1 (!%p222_p2), %vm2149_vm0, %v2148_v0  ;;  %s2152_s29 = smov (!%p222_p2), 80   ;;  %s2153_s30 = smov (!%p222_p2), 64   ;;  %vm1657_vm7 = vcmask (!%p222_p2), 785408   ;;  %vm1659_vm8 = vcmask (!%p222_p2), 916480  }
   0x8   : > { %s2154_s7 = smov (!%p222_p2), 16   ;;  %s2155_s8 = smov (!%p222_p2), 48  }
   0x9   : > { %s2156_s9 = smov (!%p222_p2), 32  }
   0xd   : > { %s2453_s22 = smov (!%p254_p3, %s1860_s22), 1 }
   0xe   : > { %s2085_s23 = smul.u32 24, %s2453_s22 }
  0x10   : > { %s258_s26 = scalar_lea.vmem %s2445_s0, %s2085_s23 }
  0x11   : > { %v2213_v1 = vld [vmem:[%s258_s26 + $0x8] sm:$0xff]  ;;  %v2217_v2 = vld [vmem:[%s258_s26] sm:$0xff]  ;;  %v2230_v12 = vld [vmem:[%s258_s26 + $0x10] sm:$0xff] }
  0x12   : > { %1947 = vmatpush3.xpose.msk.msra.mxu0 %vm270_vm1, %v2213_v1  ;;  %438 = vrot.lane.b32.xlu1 %v2213_v1, %s2150_s27 }
  0x13   : > { %1951 = vmatprep.subr.mxu0 %v2148_v0 }
  0x15   : > { %1949 = vmatmul.mubr.msk.f32.vlgmr.msra.gmra.mrb[0].mxu0 %vm270_vm1, %v2217_v2 }
  0x16   : > { %1953 = vmatprep.mubr.msk.f32.mxu0 %vm2149_vm0, %v2148_v0  ;;  %436 = vrot.lane.b32.xlu1 %v2217_v2, %s2150_s27 }
  0x17   : > { %1952 = vmatpush3.msra.mxu0 %v2230_v12 }
  0x18   : > { %1956 = vmatprep.subr.mxu0 %v2148_v0 }
  0x84   : > { %v439_v17 = vpop.permute.xlu1 %438 }
  0x88   : > { %v437_v20 = vpop.permute.xlu1 %436 }
  0xe8   : > { %v343_v3 = vpop.f32.mrb[0].mxu0 }
  0xe9   : > { %v347_v4 = vmul.f32 0.25, %v343_v3  ;;  %v1950_v5 = vpop.f32.mrb[1].mxu0 }
  0xeb   : > { %v349_v6 = vsel %vm348_vm2, %v347_v4, -inf }
  0xec   : > { %350 = vmax.xlane.f32.xlu0 %v349_v6 }
 0x179   : > { %v351_v7 = vpop.xlane.xlu0 %350 }
 0x17a   : > { %v352_v8 = vsub.f32 %v347_v4, %v351_v7 }
 0x17c   : > { %v353_v9 = vmul.f32 1.442695, %v352_v8 }
 0x17e   : > { %2104 = vpow2.f32 %v353_v9 }
 0x188   : > { %v2105_v10 = vpop.eup %2104 }
 0x189   : > { %v355_v11 = vsel %vm348_vm2, %v2105_v10, 0.0 }
 0x18a   : > { %356 = vadd.xlane.f32.xlu0 %v355_v11 }
 0x217   : > { %v357_v13 = vpop.xlane.xlu0 %356 }
 0x218   : > { %2106 = vrcp.f32 %v357_v13 }
 0x222   : > { %v2107_v14 = vpop.eup %2106 }
 0x223   : > { %v359_v15 = vmul.f32 %v2107_v14, %v357_v13 }
 0x225   : > { %v360_v16 = vsub.f32 2.0, %v359_v15 }
 0x227   : > { %v361_v18 = vmul.f32 %v2107_v14, %v360_v16 }
 0x229   : > { %v362_v19 = vmul.f32 %v2105_v10, %v361_v18 }
 0x22b   : > { %1954 = vmatmul.mubr.msk.f32.vlgmr.msra.gmra.mrb[2].mxu0 %vm348_vm2, %v362_v19 }
 0x22c   : > { %1957 = vmatpush3.xpose.msk.msra.mxu0 %vm270_vm1, %v439_v17  ;;  %1958 = vmatprep.mubr.msk.f32.mxu0 %vm2149_vm0, %v2148_v0 }
 0x22d   : > { %1961 = vmatprep.subr.mxu0 %v2148_v0 }
 0x22f   : > { %1959 = vmatmul.mubr.msk.f32.vlgmr.msra.gmra.mrb[4].mxu0 %vm270_vm1, %v437_v20 }
 0x230   : > { %1963 = vmatprep.mubr.msk.f32.mxu0 %vm2149_vm0, %v2148_v0 }
 0x2fe   : > { %v2242_v21 = vpop.f32.mrb[2].mxu0 }
 0x2ff   : > { %v1955_v22 = vpop.f32.mrb[3].mxu0 }
 0x302   : > { %v510_v23 = vpop.f32.mrb[4].mxu0 }
 0x303   : > { %v514_v24 = vmul.f32 0.25, %v510_v23  ;;  %v1960_v25 = vpop.f32.mrb[5].mxu0 }
 0x305   : > { %v515_v26 = vsel %vm348_vm2, %v514_v24, -inf }
 0x306   : > { %516 = vmax.xlane.f32.xlu0 %v515_v26 }
 0x31c   : > { %530 = vrot.lane.b32.xlu0 %v2230_v12, %s2150_s27 }
 0x320   : > { %608 = vrot.lane.b32.xlu0 %v2213_v1, %s2151_s28 }
 0x324   : > { %606 = vrot.lane.b32.xlu0 %v2217_v2, %s2151_s28 }
 0x393   : > { %v517_v27 = vpop.xlane.xlu0 %516 }
 0x394   : > { %v518_v28 = vsub.f32 %v514_v24, %v517_v27 }
 0x396   : > { %v519_v29 = vmul.f32 1.442695, %v518_v28 }
 0x397   : > { %v531_v32 = vpop.permute.xlu0 %530 }
 0x398   : > { %2108 = vpow2.f32 %v519_v29  ;;  %1962 = vmatpush3.msra.mxu0 %v531_v32 }
 0x399   : > { %1966 = vmatprep.subr.mxu0 %v2148_v0 }
 0x39b   : > { %v609_v37 = vpop.permute.xlu0 %608 }
 0x39f   : > { %v607_v40 = vpop.permute.xlu0 %606 }
 0x3a2   : > { %v2109_v30 = vpop.eup %2108 }
 0x3a3   : > { %v521_v31 = vsel %vm348_vm2, %v2109_v30, 0.0 }
 0x3a4   : > { %522 = vadd.xlane.f32.xlu1 %v521_v31 }
 0x3b5   : > { %699 = vrot.lane.b32.xlu1 %v2230_v12, %s2151_s28 }
 0x3b9   : > { %777 = vrot.lane.b32.xlu1 %v2213_v1, %s2152_s29 }
 0x3bd   : > { %775 = vrot.lane.b32.xlu1 %v2217_v2, %s2152_s29 }
 0x3c1   : > { %944 = vrot.lane.b32.xlu1 %v2217_v2, %s2153_s30 }
 0x431   : > { %v523_v33 = vpop.xlane.xlu1 %522 }
 0x432   : > { %2110 = vrcp.f32 %v523_v33 }
 0x435   : > { %v700_v41 = vpop.permute.xlu1 %699 }
 0x439   : > { %v778_v48 = vpop.permute.xlu1 %777 }
 0x43c   : > { %v2111_v34 = vpop.eup %2110 }
 0x43d   : > { %v525_v35 = vmul.f32 %v2111_v34, %v523_v33  ;;  %v776_v49 = vpop.permute.xlu1 %775 }
 0x43f   : > { %v526_v36 = vsub.f32 2.0, %v525_v35 }
 0x441   : > { %v527_v38 = vmul.f32 %v2111_v34, %v526_v36  ;;  %v945_v54 = vpop.permute.xlu1 %944 }
 0x443   : > { %v528_v39 = vmul.f32 %v2109_v30, %v527_v38 }
 0x445   : > { %1964 = vmatmul.mubr.msk.f32.vlgmr.msra.gmra.mrb[6].mxu0 %vm348_vm2, %v528_v39 }
 0x446   : > { %1967 = vmatpush3.xpose.msk.msra.mxu0 %vm270_vm1, %v609_v37  ;;  %1968 = vmatprep.mubr.msk.f32.mxu0 %vm2149_vm0, %v2148_v0 }
 0x447   : > { %1971 = vmatprep.subr.mxu0 %v2148_v0 }
 0x449   : > { %1969 = vmatmul.mubr.msk.f32.vlgmr.msra.gmra.mrb[8].mxu0 %vm270_vm1, %v607_v40 }
 0x44a   : > { %1973 = vmatprep.mubr.msk.f32.mxu0 %vm2149_vm0, %v2148_v0  ;;  %1972 = vmatpush3.msra.mxu0 %v700_v41 }
 0x44b   : > { %1976 = vmatprep.subr.mxu0 %v2148_v0 }
 0x518   : > { %v2270_v42 = vpop.f32.mrb[6].mxu0 }
 0x519   : > { %v1965_v43 = vpop.f32.mrb[7].mxu0 }
 0x51c   : > { %v680_v44 = vpop.f32.mrb[8].mxu0 }
 0x51d   : > { %v684_v45 = vmul.f32 0.25, %v680_v44  ;;  %v1970_v46 = vpop.f32.mrb[9].mxu0 }
 0x51f   : > { %v685_v47 = vsel %vm348_vm2, %v684_v45, -inf }
 0x520   : > { %686 = vmax.xlane.f32.xlu0 %v685_v47 }
 0x536   : > { %946 = vrot.lane.b32.xlu0 %v2213_v1, %s2153_s30 }
 0x53a   : > { %1451 = vrot.lane.b32.xlu0 %v2217_v2, %s2154_s7 }
 0x5ad   : > { %v687_v50 = vpop.xlane.xlu0 %686 }
 0x5ae   : > { %v688_v51 = vsub.f32 %v684_v45, %v687_v50 }
 0x5b0   : > { %v689_v52 = vmul.f32 1.442695, %v688_v51 }
 0x5b1   : > { %v947_v53 = vpop.permute.xlu0 %946 }
 0x5b2   : > { %2112 = vpow2.f32 %v689_v52  ;;  %1987 = vmatpush3.xpose.msk.msra.mxu1 %vm270_vm1, %v947_v53 }
 0x5b3   : > { %1996 = vmatprep.subr.mxu1 %v2148_v0 }
 0x5b5   : > { %1989 = vmatmul.mubr.msk.f32.vlgmr.msra.gmra.mrb[0].mxu1 %vm270_vm1, %v945_v54  ;;  %v1452_v5 = vpop.permute.xlu0 %1451 }
 0x5b6   : > { %1998 = vmatprep.mubr.msk.f32.mxu1 %vm2149_vm0, %v2148_v0 }
 0x5bc   : > { %v2113_v55 = vpop.eup %2112 }
 0x5bd   : > { %v691_v56 = vsel %vm348_vm2, %v2113_v55, 0.0 }
 0x5be   : > { %692 = vadd.xlane.f32.xlu1 %v691_v56 }
 0x5cf   : > { %1115 = vrot.lane.b32.xlu1 %v2213_v1, %s2155_s8 }
 0x5d3   : > { %1113 = vrot.lane.b32.xlu1 %v2217_v2, %s2155_s8 }
 0x5d7   : > { %1284 = vrot.lane.b32.xlu1 %v2213_v1, %s2156_s9 }
 0x5db   : > { %1282 = vrot.lane.b32.xlu1 %v2217_v2, %s2156_s9 }
 0x5df   : > { %1453 = vrot.lane.b32.xlu1 %v2213_v1, %s2154_s7 }
 0x64b   : > { %v693_v57 = vpop.xlane.xlu1 %692 }
 0x64c   : > { %2114 = vrcp.f32 %v693_v57 }
 0x64f   : > { %v1116_v58 = vpop.permute.xlu1 %1115 }
 0x650   : > { %1997 = vmatpush3.xpose.msk.msra.mxu1 %vm270_vm1, %v1116_v58 }
 0x651   : > { %2006 = vmatprep.subr.mxu1 %v2148_v0 }
 0x653   : > { %v1114_v59 = vpop.permute.xlu1 %1113 }
 0x654   : > { %1999 = vmatmul.mubr.msk.f32.vlgmr.msra.gmra.mrb[2].mxu1 %vm270_vm1, %v1114_v59 }
 0x655   : > { %2008 = vmatprep.mubr.msk.f32.mxu1 %vm2149_vm0, %v2148_v0 }
 0x656   : > { %v2115_v60 = vpop.eup %2114 }
 0x657   : > { %v695_v61 = vmul.f32 %v2115_v60, %v693_v57  ;;  %v1285_v62 = vpop.permute.xlu1 %1284 }
 0x658   : > { %2007 = vmatpush3.xpose.msk.msra.mxu1 %vm270_vm1, %v1285_v62 }
 0x659   : > { %v696_v63 = vsub.f32 2.0, %v695_v61  ;;  %2016 = vmatprep.subr.mxu1 %v2148_v0 }
 0x65b   : > { %v697_v1 = vmul.f32 %v2115_v60, %v696_v63  ;;  %v1283_v2 = vpop.permute.xlu1 %1282 }
 0x65c   : > { %2009 = vmatmul.mubr.msk.f32.vlgmr.msra.gmra.mrb[4].mxu1 %vm270_vm1, %v1283_v2 }
 0x65d   : > { %v698_v3 = vmul.f32 %v2113_v55, %v697_v1  ;;  %2018 = vmatprep.mubr.msk.f32.mxu1 %vm2149_vm0, %v2148_v0 }
 0x65f   : > { %1974 = vmatmul.mubr.msk.f32.vlgmr.msra.gmra.mrb[10].mxu0 %vm348_vm2, %v698_v3  ;;  %v1454_v4 = vpop.permute.xlu1 %1453 }
 0x660   : > { %1977 = vmatpush3.xpose.msk.msra.mxu0 %vm270_vm1, %v778_v48  ;;  %2017 = vmatpush3.xpose.msk.msra.mxu1 %vm270_vm1, %v1454_v4 }
 0x661   : > { %1978 = vmatprep.mubr.msk.f32.mxu0 %vm2149_vm0, %v2148_v0  ;;  %1981 = vmatprep.subr.mxu0 %v2148_v0 }
 0x663   : > { %1979 = vmatmul.mubr.msk.f32.vlgmr.msra.gmra.mrb[12].mxu0 %vm270_vm1, %v776_v49  ;;  %2019 = vmatmul.mubr.msk.f32.vlgmr.msra.gmra.mrb[6].mxu1 %vm270_vm1, %v1452_v5 }
 0x664   : > { %1983 = vmatprep.mubr.msk.f32.mxu0 %vm2149_vm0, %v2148_v0  ;;  %2058 = vmatprep.mubr.msk.f32.mxu1 %vm2149_vm0, %v2148_v0 }
 0x688   : > { %v1018_v6 = vpop.f32.mrb[0].mxu1 }
 0x689   : > { %v1022_v7 = vmul.f32 0.25, %v1018_v6  ;;  %v1990_v8 = vpop.f32.mrb[1].mxu1 }
 0x68b   : > { %v1023_v9 = vsel %vm348_vm2, %v1022_v7, -inf }
 0x68c   : > { %1024 = vmax.xlane.f32.xlu0 %v1023_v9 }
 0x719   : > { %v1025_v10 = vpop.xlane.xlu0 %1024 }
 0x71a   : > { %v1026_v13 = vsub.f32 %v1022_v7, %v1025_v10 }
 0x71c   : > { %v1027_v17 = vmul.f32 1.442695, %v1026_v13 }
 0x71e   : > { %2116 = vpow2.f32 %v1027_v17 }
 0x727   : > { %v1187_v11 = vpop.f32.mrb[2].mxu1 }
 0x728   : > { %v1191_v14 = vmul.f32 0.25, %v1187_v11  ;;  %v2000_v15 = vpop.f32.mrb[3].mxu1  ;;  %v2319_v32 = vpop.eup %2116 }
 0x729   : > { %v1029_v33 = vsel %vm348_vm2, %v2319_v32, 0.0 }
 0x72a   : > { %v1192_v16 = vsel %vm348_vm2, %v1191_v14, -inf }
 0x72b   : > { %1193 = vmax.xlane.f32.xlu0 %v1192_v16 }
 0x72f   : > { %v1356_v18 = vpop.f32.mrb[4].mxu1 }
 0x730   : > { %v2010_v19 = vpop.f32.mrb[5].mxu1  ;;  %v1360_v29 = vmul.f32 0.25, %v1356_v18 }
 0x732   : > { %v771_v20 = vpop.f32.mrb[10].mxu0  ;;  %v1361_v34 = vsel %vm348_vm2, %v1360_v29, -inf }
 0x733   : > { %v1975_v22 = vpop.f32.mrb[11].mxu0 }
 0x736   : > { %v849_v23 = vpop.f32.mrb[12].mxu0  ;;  %v1525_v24 = vpop.f32.mrb[6].mxu1 }
 0x737   : > { %v853_v25 = vmul.f32 0.25, %v849_v23  ;;  %v1529_v26 = vmul.f32 0.25, %v1525_v24  ;;  %v1980_v27 = vpop.f32.mrb[13].mxu0  ;;  %v2020_v28 = vpop.f32.mrb[7].mxu1 }
 0x738   : > { %v1661_v28 = vld [vmem:[%s2446_s1] sm:$0xff] }
 0x739   : > { %v1530_v30 = vsel %vm348_vm2, %v1529_v26, -inf  ;;  %v854_v31 = vsel %vm348_vm2, %v853_v25, -inf }
 0x73a   : > { %1531 = vmax.xlane.f32.xlu0 %v1530_v30  ;;  %855 = vmax.xlane.f32.xlu1 %v854_v31  ;;  %v1663_v30 = vld [vmem:[%s2446_s1 + $0x10] sm:$0xff]  ;;  %v2157_v31 = vmov 0.0|0.0  }
 0x73b   : > { %2061 = vmatprep.subr.bf16.mxu1 %v2157_v31 }
 0x73e   : > { %1030 = vadd.xlane.f32.xlu0 %v1029_v33  ;;  %1362 = vmax.xlane.f32.xlu1 %v1361_v34  ;;  %v1665_v34 = vld [vmem:[%s2446_s1 + $0x20] sm:$0xff] }
 0x7b8   : > { %v1194_v35 = vpop.xlane.xlu0 %1193 }
 0x7b9   : > { %v1195_v36 = vsub.f32 %v1191_v14, %v1194_v35  ;;  %v1666_v35 = vld [vmem:[%s2446_s1 + $0x28] sm:$0xff] }
 0x7bb   : > { %v1196_v37 = vmul.f32 1.442695, %v1195_v36  ;;  %v2068_v36 = vpack.c.bf16 %v1666_v35, %v1665_v34 }
 0x7bd   : > { %2118 = vpow2.f32 %v1196_v37  ;;  %v1667_v37 = vld [vmem:[%s2446_s1 + $0x30] sm:$0xff] }
 0x7c7   : > { %v2324_v38 = vpop.eup %2118  ;;  %v1532_v39 = vpop.xlane.xlu0 %1531 }
 0x7c8   : > { %v856_v40 = vpop.xlane.xlu1 %855  ;;  %v1533_v41 = vsub.f32 %v1529_v26, %v1532_v39  ;;  %v1198_v44 = vsel %vm348_vm2, %v2324_v38, 0.0 }
 0x7c9   : > { %v857_v43 = vsub.f32 %v853_v25, %v856_v40  ;;  %1199 = vadd.xlane.f32.xlu1 %v1198_v44  ;;  %v1669_v40 = vld [vmem:[%s2446_s1 + $0x40] sm:$0xff]  ;;  %v1671_v44 = vld [vmem:[%s2446_s1 + $0x50] sm:$0xff] }
 0x7ca   : > { %v1534_v45 = vmul.f32 1.442695, %v1533_v41  ;;  %v1670_v41 = vld [vmem:[%s2446_s1 + $0x48] sm:$0xff] }
 0x7cb   : > { %v858_v46 = vmul.f32 1.442695, %v857_v43  ;;  %v1031_v57 = vpop.xlane.xlu0 %1030  ;;  %v2074_v43 = vpack.c.bf16 %v1670_v41, %v1669_v40 }
 0x7cc   : > { %v1363_v47 = vpop.xlane.xlu1 %1362  ;;  %2120 = vpow2.f32 %v1534_v45  ;;  %v1672_v45 = vld [vmem:[%s2446_s1 + $0x58] sm:$0xff] }
 0x7cd   : > { %v1364_v48 = vsub.f32 %v1360_v29, %v1363_v47  ;;  %2122 = vpow2.f32 %v858_v46  ;;  %v1662_v29 = vld [vmem:[%s2446_s1 + $0x8] sm:$0xff]  ;;  %v2077_v46 = vpack.c.bf16 %v1672_v45, %v1671_v44  ;;  %v1673_v47 = vld [vmem:[%s2446_s1 + $0x60] sm:$0xff] }
 0x7cf   : > { %v1365_v49 = vmul.f32 1.442695, %v1364_v48  ;;  %v1674_v48 = vld [vmem:[%s2446_s1 + $0x68] sm:$0xff] }
 0x7d1   : > { %2124 = vpow2.f32 %v1365_v49  ;;  %v2080_v49 = vpack.c.bf16 %v1674_v48, %v1673_v47 }
 0x7d2   : > { %2126 = vrcp.f32 %v1031_v57 }
 0x7d6   : > { %v2328_v50 = vpop.eup %2120 }
 0x7d7   : > { %v1536_v51 = vsel %vm348_vm2, %v2328_v50, 0.0  ;;  %v2123_v52 = vpop.eup %2122 }
 0x7d8   : > { %1537 = vadd.xlane.f32.xlu1 %v1536_v51  ;;  %v860_v54 = vsel %vm348_vm2, %v2123_v52, 0.0  ;;  %v1675_v51 = vld [vmem:[%s2446_s1 + $0x70] sm:$0xff] }
 0x7db   : > { %v2125_v53 = vpop.eup %2124 }
 0x7dc   : > { %v1367_v55 = vsel %vm348_vm2, %v2125_v53, 0.0  ;;  %861 = vadd.xlane.f32.xlu1 %v860_v54  ;;  %v2127_v62 = vpop.eup %2126 }
 0x7dd   : > { %1368 = vadd.xlane.f32.xlu0 %v1367_v55  ;;  %v1033_v63 = vmul.f32 %v2127_v62, %v1031_v57 }
 0x7ed   : > { %1037 = vrot.lane.b32.xlu1 %v2230_v12, %s2153_s30 }
 0x7f1   : > { %1206 = vrot.lane.b32.xlu1 %v2230_v12, %s2155_s8 }
 0x7f3   : > { %868 = vrot.lane.b32.xlu0 %v2230_v12, %s2152_s29 }
 0x7f5   : > { %1544 = vrot.lane.b32.xlu1 %v2230_v12, %s2154_s7 }
 0x7f7   : > { %1375 = vrot.lane.b32.xlu0 %v2230_v12, %s2156_s9 }
 0x7f9   : > { %1625 = vrot.lane.b32.xlu1 %v771_v20, %s2156_s9 }
 0x7fb   : > { %1621 = vrot.lane.b32.xlu0 %v2270_v42, %s2154_s7  ;;  %v1034_v42 = vsub.f32 2.0, %v1033_v63 }
 0x7fd   : > { %v1035_v7 = vmul.f32 %v2127_v62, %v1034_v42 }
 0x7ff   : > { %v1036_v14 = vmul.f32 %v2319_v32, %v1035_v7  ;;  %v2062_v32 = vpack.c.bf16 %v1662_v29, %v1661_v28 }
 0x801   : > { %2063 = vmatpush3.bf16.msra.mxu1 %v2062_v32 }
 0x802   : > { %2064 = vmatprep.subr.bf16.mxu1 %v2157_v31 }
 0x856   : > { %v1200_v56 = vpop.xlane.xlu1 %1199 }
 0x857   : > { %2128 = vrcp.f32 %v1200_v56 }
 0x861   : > { %v2129_v12 = vpop.eup %2128 }
 0x862   : > { %v1202_v3 = vmul.f32 %v2129_v12, %v1200_v56 }
 0x864   : > { %v1203_v8 = vsub.f32 2.0, %v1202_v3 }
 0x865   : > { %v1538_v58 = vpop.xlane.xlu1 %1537 }
 0x866   : > { %v1204_v15 = vmul.f32 %v2129_v12, %v1203_v8 }
 0x868   : > { %v1205_v19 = vmul.f32 %v2324_v38, %v1204_v15  ;;  %v1668_v38 = vld [vmem:[%s2446_s1 + $0x38] sm:$0xff] }
 0x869   : > { %v862_v60 = vpop.xlane.xlu1 %861  ;;  %v2071_v39 = vpack.c.bf16 %v1668_v38, %v1667_v37 }
 0x86a   : > { %v1369_v59 = vpop.xlane.xlu0 %1368  ;;  %2130 = vrcp.f32 %v862_v60 }
 0x86b   : > { %2132 = vrcp.f32 %v1369_v59 }
 0x86c   : > { %2134 = vrcp.f32 %v1538_v58 }
 0x86d   : > { %v1038_v11 = vpop.permute.xlu1 %1037 }
 0x86e   : > { %v869_v61 = vpop.permute.xlu0 %868 }
 0x86f   : > { %1982 = vmatpush3.msra.mxu0 %v869_v61 }
 0x870   : > { %1991 = vmatprep.subr.mxu0 %v2148_v0 }
 0x871   : > { %v1207_v18 = vpop.permute.xlu1 %1206 }
 0x872   : > { %v1376_v23 = vpop.permute.xlu0 %1375 }
 0x874   : > { %v2131_v1 = vpop.eup %2130 }
 0x875   : > { %v864_v2 = vmul.f32 %v2131_v1, %v862_v60  ;;  %v2133_v5 = vpop.eup %2132  ;;  %v1545_v26 = vpop.permute.xlu1 %1544 }
 0x876   : > { %v1371_v9 = vmul.f32 %v2133_v5, %v1369_v59  ;;  %v2135_v13 = vpop.eup %2134  ;;  %v1622_v12 = vpop.permute.xlu0 %1621 }
 0x877   : > { %v865_v4 = vsub.f32 2.0, %v864_v2  ;;  %v1540_v16 = vmul.f32 %v2135_v13, %v1538_v58  ;;  %v1648_v42 = vsel %vm270_vm1, %v2242_v21, %v1622_v12  ;;  %v1892_v21 = vld [vmem:[%s2447_s2] ss:$0 sm:$0xff] }
 0x878   : > { %v1372_v17 = vsub.f32 2.0, %v1371_v9 }
 0x879   : > { %v866_v6 = vmul.f32 %v2131_v1, %v865_v4  ;;  %v1541_v20 = vsub.f32 2.0, %v1540_v16  ;;  %v1626_v63 = vpop.permute.xlu1 %1625 }
 0x87a   : > { %v1373_v22 = vmul.f32 %v2133_v5, %v1372_v17  ;;  %v1650_v3 = vsel %vm1649_vm3, %v1648_v42, %v1626_v63 }
 0x87b   : > { %v867_v10 = vmul.f32 %v2123_v52, %v866_v6  ;;  %v1542_v24 = vmul.f32 %v2135_v13, %v1541_v20  ;;  %v1676_v52 = vld [vmem:[%s2446_s1 + $0x78] sm:$0xff] }
 0x87c   : > { %v1374_v25 = vmul.f32 %v2125_v53, %v1373_v22  ;;  %v2083_v54 = vpack.c.bf16 %v1676_v52, %v1675_v51 }
 0x87d   : > { %1984 = vmatmul.mubr.msk.f32.vlgmr.msra.gmra.mrb[14].mxu0 %vm348_vm2, %v867_v10  ;;  %v1543_v27 = vmul.f32 %v2328_v50, %v1542_v24 }
 0x87e   : > { %1992 = vmatpush3.msra.mxu0 %v1038_v11  ;;  %1993 = vmatprep.mubr.msk.f32.mxu0 %vm2149_vm0, %v2148_v0 }
 0x87f   : > { %2001 = vmatprep.subr.mxu0 %v2148_v0 }
 0x881   : > { %1994 = vmatmul.mubr.msk.f32.vlgmr.msra.gmra.mrb[16].mxu0 %vm348_vm2, %v1036_v14 }
 0x882   : > { %2002 = vmatpush3.msra.mxu0 %v1207_v18  ;;  %2003 = vmatprep.mubr.msk.f32.mxu0 %vm2149_vm0, %v2148_v0 }
 0x883   : > { %2011 = vmatprep.subr.mxu0 %v2148_v0 }
 0x885   : > { %2004 = vmatmul.mubr.msk.f32.vlgmr.msra.gmra.mrb[18].mxu0 %vm348_vm2, %v1205_v19 }
 0x886   : > { %2012 = vmatpush3.msra.mxu0 %v1376_v23  ;;  %2013 = vmatprep.mubr.msk.f32.mxu0 %vm2149_vm0, %v2148_v0 }
 0x887   : > { %2021 = vmatprep.subr.mxu0 %v2148_v0 }
 0x889   : > { %2014 = vmatmul.mubr.msk.f32.vlgmr.msra.gmra.mrb[20].mxu0 %vm348_vm2, %v1374_v25 }
 0x88a   : > { %2022 = vmatpush3.msra.mxu0 %v1545_v26  ;;  %2023 = vmatprep.mubr.msk.f32.mxu0 %vm2149_vm0, %v2148_v0  ;;  %v1664_v0 = vld [vmem:[%s2446_s1 + $0x18] sm:$0xff] }
 0x88b   : > { %v2065_v33 = vpack.c.bf16 %v1664_v0, %v1663_v30  ;;  %v1893_v0 = vld [vmem:[%s2449_s4] ss:$0 sm:$0xff] }
 0x88d   : > { %2024 = vmatmul.mubr.msk.f32.vlgmr.msra.gmra.mrb[22].mxu0 %vm348_vm2, %v1543_v27  ;;  %2066 = vmatpush3.bf16.msra.mxu1 %v2065_v33 }
 0x88e   : > { %2067 = vmatprep.subr.bf16.mxu1 %v2157_v31 }
 0x891   : > { %2069 = vmatpush3.bf16.msra.mxu1 %v2068_v36  ;;  %v1894_v36 = vld [vmem:[%s2450_s5] ss:$0 sm:$0xff] }
 0x892   : > { %2070 = vmatprep.subr.bf16.mxu1 %v2157_v31 }
 0x895   : > { %2072 = vmatpush3.bf16.msra.mxu1 %v2071_v39 }
 0x896   : > { %2073 = vmatprep.subr.bf16.mxu1 %v2157_v31 }
 0x899   : > { %2075 = vmatpush3.bf16.msra.mxu1 %v2074_v43 }
 0x89a   : > { %2076 = vmatprep.subr.bf16.mxu1 %v2157_v31 }
 0x89d   : > { %2078 = vmatpush3.bf16.msra.mxu1 %v2077_v46 }
 0x89e   : > { %2079 = vmatprep.subr.bf16.mxu1 %v2157_v31 }
 0x8a1   : > { %2081 = vmatpush3.bf16.msra.mxu1 %v2080_v49 }
 0x8a2   : > { %2082 = vmatprep.subr.bf16.mxu1 %v2157_v31 }
 0x8a5   : > { %2084 = vmatpush3.bf16.msra.mxu1 %v2083_v54 }
 0x950   : > { %v940_v50 = vpop.f32.mrb[14].mxu0 }
 0x951   : > { %1629 = vrot.lane.b32.xlu0 %v940_v50, %s2155_s8  ;;  %v1985_v53 = vpop.f32.mrb[15].mxu0 }
 0x954   : > { %v1109_v55 = vpop.f32.mrb[16].mxu0 }
 0x955   : > { %1633 = vrot.lane.b32.xlu1 %v1109_v55, %s2153_s30  ;;  %v1995_v56 = vpop.f32.mrb[17].mxu0 }
 0x958   : > { %v1278_v57 = vpop.f32.mrb[18].mxu0 }
 0x959   : > { %1637 = vrot.lane.b32.xlu0 %v1278_v57, %s2152_s29  ;;  %v2005_v58 = vpop.f32.mrb[19].mxu0 }
 0x95c   : > { %v1447_v59 = vpop.f32.mrb[20].mxu0 }
 0x95d   : > { %1641 = vrot.lane.b32.xlu1 %v1447_v59, %s2151_s28  ;;  %v2015_v60 = vpop.f32.mrb[21].mxu0 }
 0x960   : > { %v1616_v61 = vpop.f32.mrb[22].mxu0 }
 0x961   : > { %1645 = vrot.lane.b32.xlu0 %v1616_v61, %s2150_s27  ;;  %v2025_v62 = vpop.f32.mrb[23].mxu0  ;;  %s1866_s27 = sshll.u32 %s2453_s22, 3 }
 0x962   : > { %s262_s30 = scalar_lea.vmem %s2448_s3, %s1866_s27  ;;  %s266_s15 = scalar_lea.vmem %s2451_s6, %s1866_s27 }
 0x963   : > { %v1754_v14 = vld [vmem:[%s262_s30] sm:$0xff] }
 0x9c3   : > { %v1630_v1 = vpop.permute.xlu0 %1629 }
 0x9c4   : > { %v1652_v5 = vsel %vm1651_vm4, %v1650_v3, %v1630_v1 }
 0x9c7   : > { %v1634_v2 = vpop.permute.xlu1 %1633 }
 0x9c8   : > { %v1654_v7 = vsel %vm1653_vm5, %v1652_v5, %v1634_v2 }
 0x9cb   : > { %v1638_v4 = vpop.permute.xlu0 %1637 }
 0x9cc   : > { %v1656_v8 = vsel %vm1655_vm6, %v1654_v7, %v1638_v4 }
 0x9cf   : > { %v1642_v6 = vpop.permute.xlu1 %1641 }
 0x9d0   : > { %v1658_v9 = vsel %vm1657_vm7, %v1656_v8, %v1642_v6 }
 0x9d3   : > { %v1646_v10 = vpop.permute.xlu0 %1645 }
 0x9d4   : > { %v1660_v11 = vsel %vm1659_vm8, %v1658_v9, %v1646_v10 }
 0x9d5   : > { %2059 = vmatmul.mubr.f32.vlgmr.msra.gmra.mrb[8].mxu1 %v1660_v11 }
 0xaa8   : > { %v1750_v13 = vpop.f32.mrb[8].mxu1 }
 0xaa9   : > { %v1751_v15 = vadd.f32 %v1892_v21, %v1750_v13  ;;  %v2060_v16 = vpop.f32.mrb[9].mxu1 }
 0xaab   : > { %v1757_v17 = vadd.f32 %v1754_v14, %v1751_v15 }
 0xaad   : > { %1758 = vadd.xlane.f32.xlu1 %v1757_v17 }
 0xb3a   : > { %v1759_v18 = vpop.xlane.xlu1 %1758 }
 0xb3b   : > { %v1761_v19 = vmul.f32 0.0078125, %v1759_v18 }
 0xb3d   : > { %v1762_v20 = vsub.f32 %v1757_v17, %v1761_v19 }
 0xb3f   : > { %v1763_v22 = vmul.f32 %v1762_v20, %v1762_v20  ;;  %v1780_v34 = vmul.f32 %v1893_v0, %v1762_v20 }
 0xb41   : > { %1764 = vadd.xlane.f32.xlu0 %v1763_v22 }
 0xbce   : > { %v1765_v23 = vpop.xlane.xlu0 %1764 }
 0xbcf   : > { %v1766_v24 = vmul.f32 0.007874016, %v1765_v23 }
 0xbd1   : > { %2136 = vrsqrt.f32 %v1766_v24  ;;  %vm1769_vm9 = vcmp.eq.f32.partialorder %v1766_v24, inf  ;;  %v1772_v27 = vand.u32 2147483648, %v1766_v24  ;;  %vm1771_vm10 = vcmp.eq.f32.partialorder %v1766_v24, 0.0 }
 0xbdb   : > { %v2137_v25 = vpop.eup %2136 }
 0xbdc   : > { %v1768_v26 = vmul.f32 %v2137_v25, %v1766_v24 }
 0xbde   : > { %v1770_v28 = vsel %vm1769_vm9, %v1766_v24, %v1768_v26 }
 0xbdf   : > { %v1773_v29 = vsel %vm1771_vm10, %v1772_v27, %v1770_v28 }
 0xbe0   : > { %v1781_v30 = vadd.f32 0.2, %v1773_v29 }
 0xbe2   : > { %2138 = vrcp.f32 %v1781_v30 }
 0xbec   : > { %v2139_v31 = vpop.eup %2138 }
 0xbed   : > { %v1783_v32 = vmul.f32 %v2139_v31, %v1781_v30 }
 0xbef   : > { %v1784_v33 = vsub.f32 2.0, %v1783_v32 }
 0xbf1   : > { %v1785_v35 = vmul.f32 %v2139_v31, %v1784_v33 }
 0xbf3   : > { %v1786_v37 = vmul.f32 %v1785_v35, %v1780_v34 }
 0xbf5   : > { %v1793_v38 = vadd.f32 %v1894_v36, %v1786_v37 }
 0xbf7   : > { %1794 = vst [vmem:[%s266_s15] sm:$0xff] %v1793_v38 }
 0xbf8 PF: > { %s16_s21 = sadd.s32 1, %s2146_s21  }
 0xbf9   : > { %p13_p4 = scmp.ge.s32.totalorder %s16_s21, 4  }
 0xbfb   :  { %15 = sbr.rel (!%p13_p4) target bundleno = 1 (0x1), region = 77 }

// kernel: encoder_forward.13
= control target key start
LH: loop header
LB: loop body
LE: loop exit
PB: predicated region body
PF: predicated region fallthrough
CT: control target
= control target key end

     0   :  { %12 = vsyncpa [#allocation3], 0  ;;  %s1119_s0 = inlined_call_operand.vmem [shape: f32[16,128], index: 0, kind: input, shape index: {}]   ;;  %s1120_s1 = inlined_call_operand.vmem [shape: f32[128,128], index: 1, kind: input, shape index: {}]   ;;  %s1121_s2 = inlined_call_operand.vmem [shape: f32[1,128], index: 2, kind: input, shape index: {}]   ;;  %s1122_s3 = inlined_call_operand.vmem [shape: f32[128,128], index: 3, kind: input, shape index: {}]   ;;  %s1123_s4 = inlined_call_operand.vmem [shape: f32[1,128], index: 4, kind: input, shape index: {}]   ;;  %s1124_s5 = inlined_call_operand.vmem [shape: f32[1,128], index: 5, kind: input, shape index: {}]   ;;  %s1125_s6 = inlined_call_operand.vmem [shape: f32[1,128], index: 6, kind: input, shape index: {}]   ;;  %s1126_s7 = inlined_call_operand.hbm [shape: f32[16,128], index: 7, kind: output, shape index: {}]  }
   0x1   :  { %14 = vsyncpa [#allocation3 + $0x1], 0  ;;  %s895_s24 = smov 0   ;;  %s897_s25 = smov 0  }
   0x2   :  { %s899_s26 = smov 0   ;;  %s901_s27 = smov 0  }
   0x3 LB: > { %s916_s28 = sadd.s32 4294967295, %s849_s27   ;;  %s575_s29 = sadd.s32 4294967294, %s849_s27   ;;  %s849_s27 = sphi %s901_s27, %s1132_s27   ;;  %s845_s26 = sphi %s899_s26, %s1131_s26   ;;  %s841_s25 = sphi %s897_s25, %s1130_s25   ;;  %s837_s24 = sphi %s895_s24, %s1129_s24  }
   0x4   : > { %s920_s30 = sadd.s32 1, %s849_s27   ;;  %s179_s8 = sadd.s32 1, %s845_s26 }
   0x5   : > { %s176_s9 = ssub.s32 %s849_s27, %s920_s30  ;;  %p189_p0 = scmp.ne.s32.totalorder %s845_s26, %s841_s25 }
   0x6   : > { %p177_p1 = scmp.eq.s32.totalorder %s176_s9, 0  ;;  %p190_p2 = scmp.eq.s32.totalorder %s916_s28, 1 }
   0x7   : > { %p195_p3 = scmp.ne.s32.totalorder %s841_s25, %s837_s24  ;;  %p196_p4 = scmp.eq.s32.totalorder %s575_s29, 1 }
   0x8   : > { %s931_s10 = scalar_select %p177_p1, %s845_s26, %s179_s8  }
   0x9   : > { %p933_p5 = por %p190_p2, %p189_p0  ;;  %p937_p6 = por %p196_p4, %p195_p3 }
   0xa   : > { %p578_p7 = scmp.ge.s32.totalorder %s849_s27, 1  ;;  %p239_p8 = scmp.lt.s32.totalorder %s849_s27, 3 }
   0xc   : > { %p240_p9 = pnand %p578_p7, %p239_p8 }
   0xd   : > { %v275_v0 = vld [vmem:[%s1120_s1] sm:$0xff] (!%p240_p9)  ;;  %v276_v1 = vld [vmem:[%s1120_s1 + $0x8] sm:$0xff] (!%p240_p9)  ;;  %v277_v2 = vld [vmem:[%s1120_s1 + $0x10] sm:$0xff] (!%p240_p9)  ;;  %v851_v3 = vmov (!%p240_p9), 0.0|0.0   ;;  %vm852_vm0 = vmmov (!%p240_p9), 0   ;;  %v853_v6 = vmov (!%p240_p9), 0.0  }
   0xe   : > { %243 = sbr.rel (%p240_p9) target bundleno = 823 (0x337), region = 48  ;;  %693 = vmatprep.subr.bf16.mxu0 (!%p240_p9), %v851_v3  ;;  %v694_v4 = vpack.c.bf16 (!%p240_p9), %v276_v1, %v275_v0  ;;  %v278_v5 = vld [vmem:[%s1120_s1 + $0x18] sm:$0xff] (!%p240_p9)  ;;  %655 = vmatprep.mubr.msk.f32.mxu0 (!%p240_p9), %vm852_vm0, %v853_v6  ;;  %v279_v8 = vld [vmem:[%s1120_s1 + $0x20] sm:$0xff] (!%p240_p9)  ;;  %v280_v9 = vld [vmem:[%s1120_s1 + $0x28] sm:$0xff] (!%p240_p9)  ;;  %p270_p10 = scmp.lt.s32.totalorder (!%p240_p9), %s916_s28, 1 }
   0xf   : > { %717 = vmatprep.subr.bf16.mxu1 (!%p240_p9), %v851_v3  ;;  %690 = vmatprep.mubr.msk.f32.mxu1 (!%p240_p9), %vm852_vm0, %v853_v6  ;;  %v697_v7 = vpack.c.bf16 (!%p240_p9), %v278_v5, %v277_v2  ;;  %v369_v10 = vld [vmem:[%s1122_s3] sm:$0xff] (!%p240_p9)  ;;  %v370_v11 = vld [vmem:[%s1122_s3 + $0x8] sm:$0xff] (!%p240_p9)  ;;  %v371_v13 = vld [vmem:[%s1122_s3 + $0x10] sm:$0xff] (!%p240_p9)  ;;  %v700_v15 = vpack.c.bf16 (!%p240_p9), %v280_v9, %v279_v8  ;;  %s267_s16 = sand.u32 (!%p240_p9), 1, %s841_s25  }
  0x10   : > { %695 = vmatpush3.bf16.msra.mxu0 (!%p240_p9), %v694_v4  ;;  %v718_v12 = vpack.c.bf16 (!%p240_p9), %v370_v11, %v369_v10  ;;  %v372_v14 = vld [vmem:[%s1122_s3 + $0x18] sm:$0xff] (!%p240_p9)  ;;  %v281_v16 = vld [vmem:[%s1120_s1 + $0x30] sm:$0xff] (!%p240_p9)  ;;  %v373_v19 = vld [vmem:[%s1122_s3 + $0x20] sm:$0xff] (!%p240_p9)  ;;  %s579_s17 = sshll.u32 (!%p240_p9), %s267_s16, 3 }
  0x11   : > { %696 = vmatprep.subr.bf16.mxu0 (!%p240_p9), %v851_v3  ;;  %v282_v17 = vld [vmem:[%s1120_s1 + $0x38] sm:$0xff] (!%p240_p9)  ;;  %v721_v18 = vpack.c.bf16 (!%p240_p9), %v372_v14, %v371_v13  ;;  %v374_v20 = vld [vmem:[%s1122_s3 + $0x28] sm:$0xff] (!%p240_p9)  ;;  %v283_v22 = vld [vmem:[%s1120_s1 + $0x40] sm:$0xff] (!%p240_p9)  ;;  %s269_s23 = scalar_lea.vmem (!%p240_p9), [#allocation2], %s579_s17 }
  0x12   : > { %719 = vmatpush3.bf16.msra.mxu1 (!%p240_p9), %v718_v12  ;;  %v703_v21 = vpack.c.bf16 (!%p240_p9), %v282_v17, %v281_v16  ;;  %v284_v23 = vld [vmem:[%s1120_s1 + $0x48] sm:$0xff] (!%p240_p9)  ;;  %v724_v24 = vpack.c.bf16 (!%p240_p9), %v374_v20, %v373_v19  ;;  %v375_v25 = vld [vmem:[%s1122_s3 + $0x30] sm:$0xff] (!%p240_p9)  ;;  %v376_v26 = vld [vmem:[%s1122_s3 + $0x38] sm:$0xff] (!%p240_p9)  ;;  %s516_s29 = sshll.u32 (!%p240_p9), %s269_s23, 4  ;;  %s1079_s29 = int_to_ptr.vmem [resolvable:$true] %s516_s29 }
  0x13   : > { %720 = vmatprep.subr.bf16.mxu1 (!%p240_p9), %v851_v3  ;;  %v706_v27 = vpack.c.bf16 (!%p240_p9), %v284_v23, %v283_v22  ;;  %v285_v28 = vld [vmem:[%s1120_s1 + $0x50] sm:$0xff] (!%p240_p9)  ;;  %v286_v29 = vld [vmem:[%s1120_s1 + $0x58] sm:$0xff] (!%p240_p9)  ;;  %v727_v30 = vpack.c.bf16 (!%p240_p9), %v376_v26, %v375_v25  ;;  %v377_v31 = vld [vmem:[%s1122_s3 + $0x40] sm:$0xff] (!%p240_p9)  ;;  %s787_s15 = scalar_lea.vmem (!%p240_p9), %s1079_s29, 128 }
  0x14   : > { %698 = vmatpush3.bf16.msra.mxu0 (!%p240_p9), %v697_v7  ;;  %v378_v32 = vld [vmem:[%s1122_s3 + $0x48] sm:$0xff] (!%p240_p9)  ;;  %v709_v33 = vpack.c.bf16 (!%p240_p9), %v286_v29, %v285_v28  ;;  %v287_v34 = vld [vmem:[%s1120_s1 + $0x60] sm:$0xff] (!%p240_p9)  ;;  %v379_v37 = vld [vmem:[%s1122_s3 + $0x50] sm:$0xff] (!%p240_p9)  ;;  %p788_p11 = scmp.ne.s32.totalorder (!%p240_p9), %s1079_s29, %s787_s15 }
  0x15   : > { %699 = vmatprep.subr.bf16.mxu0 %v851_v3  ;;  %v288_v35 = vld [vmem:[%s1120_s1 + $0x68] sm:$0xff]  ;;  %v730_v36 = vpack.c.bf16 %v378_v32, %v377_v31  ;;  %s271_s19 = scalar_select %p270_p10, %s916_s28, 1  ;;  %v380_v38 = vld [vmem:[%s1122_s3 + $0x58] sm:$0xff]  ;;  %v289_v40 = vld [vmem:[%s1120_s1 + $0x70] sm:$0xff] }
  0x16   : > { %722 = vmatpush3.bf16.msra.mxu1 %v721_v18  ;;  %v712_v39 = vpack.c.bf16 %v288_v35, %v287_v34  ;;  %v290_v41 = vld [vmem:[%s1120_s1 + $0x78] sm:$0xff]  ;;  %v733_v42 = vpack.c.bf16 %v380_v38, %v379_v37  ;;  %v381_v43 = vld [vmem:[%s1122_s3 + $0x60] sm:$0xff]  ;;  %v382_v44 = vld [vmem:[%s1122_s3 + $0x68] sm:$0xff]  ;;  %p789_p12 = pnand %p788_p11, %p933_p5 }
  0x17   : > { %723 = vmatprep.subr.bf16.mxu1 %v851_v3  ;;  %s580_s14 = sshll.u32 %s271_s19, 3  ;;  %v715_v45 = vpack.c.bf16 %v290_v41, %v289_v40  ;;  %v736_v46 = vpack.c.bf16 %v382_v44, %v381_v43  ;;  %v383_v48 = vld [vmem:[%s1122_s3 + $0x70] sm:$0xff]  ;;  %v384_v49 = vld [vmem:[%s1122_s3 + $0x78] sm:$0xff]  ;;  %v581_v51 = vld [vmem:[%s1121_s2] ss:$0 sm:$0xff]  ;;  %s586_s19 = sshll.u32 %s916_s28, 7 }
  0x18   : > { %701 = vmatpush3.bf16.msra.mxu0 %v700_v15  ;;  %s273_s22 = scalar_lea.vmem %s1119_s0, %s580_s14  ;;  %v739_v50 = vpack.c.bf16 %v384_v49, %v383_v48  ;;  %v582_v56 = vld [vmem:[%s1123_s4] ss:$0 sm:$0xff]  ;;  %s1077_s13 = scalar_lea.hbm %s1126_s7, %s586_s19 }
  0x19   : > { %702 = vmatprep.subr.bf16.mxu0 %v851_v3  ;;  %v274_v47 = vld [vmem:[%s273_s22] sm:$0xff]  ;;  %s503_s14 = scalar_lea.sflag [#allocation3], %s267_s16  ;;  %p790_p13 = pneg %p789_p12 }
  0x1a   : > { %725 = vmatpush3.bf16.msra.mxu1 %v724_v24  ;;  %v583_v11 = vld [vmem:[%s1124_s5] ss:$0 sm:$0xff]  ;;  %s854_s28 = smov [#allocation2]  }
  0x1b   : > { %726 = vmatprep.subr.bf16.mxu1 %v851_v3  ;;  %v584_v15 = vld [vmem:[%s1125_s6] ss:$0 sm:$0xff]  ;;  %s791_s17 = sshll.u32 %s854_s28, 4  ;;  %s792_s17 = int_to_ptr.vmem [resolvable:$false] %s791_s17 }
  0x1c   : > { %704 = vmatpush3.bf16.msra.mxu0 %v703_v21  ;;  %s793_s18 = scalar_lea.vmem %s792_s17, 256  ;;  %p794_p0 = scmp.lt.s32.totalorder %s1079_s29, %s792_s17 }
  0x1d   : > { %705 = vmatprep.subr.bf16.mxu0 %v851_v3  ;;  %p795_p1 = scmp.lt.s32.totalorder %s793_s18, %s787_s15 }
  0x1e   : > { %728 = vmatpush3.bf16.msra.mxu1 %v727_v30 }
  0x1f   : > { %729 = vmatprep.subr.bf16.mxu1 %v851_v3  ;;  %p796_p2 = por %p795_p1, %p794_p0 }
  0x20   : > { %707 = vmatpush3.bf16.msra.mxu0 %v706_v27 }
  0x21   : > { %708 = vmatprep.subr.bf16.mxu0 %v851_v3  ;;  %p797_p3 = pnand %p796_p2, %p790_p13 }
  0x22   : > { %731 = vmatpush3.bf16.msra.mxu1 %v730_v36 }
  0x23   : > { %732 = vmatprep.subr.bf16.mxu1 %v851_v3 }
  0x24   : > { %710 = vmatpush3.bf16.msra.mxu0 %v709_v33 }
  0x25   : > { %711 = vmatprep.subr.bf16.mxu0 %v851_v3 }
  0x26   : > { %734 = vmatpush3.bf16.msra.mxu1 %v733_v42 }
  0x27   : > { %735 = vmatprep.subr.bf16.mxu1 %v851_v3 }
  0x28   : > { %713 = vmatpush3.bf16.msra.mxu0 %v712_v39 }
  0x29   : > { %714 = vmatprep.subr.bf16.mxu0 %v851_v3 }
  0x2a   : > { %737 = vmatpush3.bf16.msra.mxu1 %v736_v46 }
  0x2b   : > { %738 = vmatprep.subr.bf16.mxu1 %v851_v3 }
  0x2c   : > { %716 = vmatpush3.bf16.msra.mxu0 %v715_v45 }
  0x2e   : > { %740 = vmatpush3.bf16.msra.mxu1 %v739_v50 }
  0x2f   : > { %656 = vmatmul.mubr.f32.vlgmr.msra.gmra.mrb[0].mxu0 %v274_v47 }
 0x102   : > { %v364_v52 = vpop.f32.mrb[0].mxu0 }
 0x103   : > { %v365_v53 = vadd.f32 %v581_v51, %v364_v52  ;;  %v657_v54 = vpop.f32.mrb[1].mxu0 }
 0x105   : > { %v368_v55 = vmax.f32 %v365_v53, 0.0 }
 0x107   : > { %691 = vmatmul.mubr.f32.vlgmr.msra.gmra.mrb[0].mxu1 %v368_v55 }
 0x1da   : > { %v458_v57 = vpop.f32.mrb[0].mxu1 }
 0x1db   : > { %v459_v58 = vadd.f32 %v582_v56, %v458_v57  ;;  %v692_v59 = vpop.f32.mrb[1].mxu1 }
 0x1dd   : > { %v464_v60 = vadd.f32 %v459_v58, %v274_v47 }
 0x1df   : > { %465 = vadd.xlane.f32.xlu0 %v464_v60 }
 0x26c   : > { %v466_v61 = vpop.xlane.xlu0 %465 }
 0x26d   : > { %v468_v62 = vmul.f32 0.0078125, %v466_v61 }
 0x26f   : > { %v469_v63 = vsub.f32 %v464_v60, %v468_v62 }
 0x271   : > { %v470_v0 = vmul.f32 %v469_v63, %v469_v63  ;;  %v487_v13 = vmul.f32 %v583_v11, %v469_v63 }
 0x273   : > { %471 = vadd.xlane.f32.xlu0 %v470_v0 }
 0x300   : > { %v472_v1 = vpop.xlane.xlu0 %471 }
 0x301   : > { %v473_v2 = vmul.f32 0.007874016, %v472_v1 }
 0x303   : > { %783 = vrsqrt.f32 %v473_v2  ;;  %vm476_vm1 = vcmp.eq.f32.partialorder %v473_v2, inf  ;;  %v479_v5 = vand.u32 2147483648, %v473_v2  ;;  %vm478_vm2 = vcmp.eq.f32.partialorder %v473_v2, 0.0 }
 0x30d   : > { %v784_v3 = vpop.eup %783 }
 0x30e   : > { %v475_v4 = vmul.f32 %v784_v3, %v473_v2 }
 0x310   : > { %v477_v6 = vsel %vm476_vm1, %v473_v2, %v475_v4 }
 0x311   : > { %v480_v7 = vsel %vm478_vm2, %v479_v5, %v477_v6 }
 0x312   : > { %v488_v8 = vadd.f32 0.2, %v480_v7 }
 0x314   : > { %785 = vrcp.f32 %v488_v8 }
 0x31e   : > { %v786_v9 = vpop.eup %785 }
 0x31f   : > { %v490_v10 = vmul.f32 %v786_v9, %v488_v8 }
 0x321   : > { %v491_v12 = vsub.f32 2.0, %v490_v10 }
 0x323   : > { %v492_v14 = vmul.f32 %v786_v9, %v491_v12 }
 0x325   : > { %v493_v16 = vmul.f32 %v492_v14, %v487_v13 }
 0x327   : > { %v500_v17 = vadd.f32 %v584_v15, %v493_v16 }
 0x329   : > { %501 = vst [vmem:[%s269_s23] sm:$0xff] %v500_v17 }
 0x32a   : > { %800 = shalt.err (!%p797_p3)
}
 0x32b   : > { %s801_s16 = scalar_lea.hbm %s1077_s13, 128  ;;  %s805_s22 = scalar_lea.hbm %s1126_s7, 256 }
 0x32c   : > { %p802_p4 = scmp.ne.s32.totalorder %s1077_s13, %s801_s16  ;;  %p806_p9 = scmp.lt.u32.totalorder %s1077_s13, %s1126_s7 }
 0x32d   : > { %p807_p10 = scmp.lt.u32.totalorder %s805_s22, %s801_s16  ;;  %p809_p12 = scmp.lt.u32.totalorder %s801_s16, %s1077_s13 }
 0x32e   : > { %p803_p7 = pnand %p802_p4, %p933_p5 }
 0x32f   : > { %p808_p11 = por %p807_p10, %p806_p9 }
 0x330   : > { %p804_p8 = pneg %p803_p7 }
 0x331   : > { %p810_p13 = por %p809_p12, %p808_p11 }
 0x333   : > { %p811_p0 = pnand %p810_p13, %p804_p8 }
 0x335   : > { %814 = shalt.err (!%p811_p0)
}
 0x336   : > { %741 = dma.vmem_to_hbm [thread:$0]  (%p933_p5), %s1079_s29, 128, %s1077_s13, %s503_s14  }
 0x337 PF: > { %p747_p1 = scmp.ge.s32.totalorder %s849_s27, 2  ;;  %s528_s8 = sand.u32 1, %s837_s24  }
 0x338   : > { %s529_s9 = scalar_lea.sflag [#allocation3], %s528_s8 }
 0x339   : > { %p744_p2 = pnand %p747_p1, %p937_p6 }
 0x33b   : > { %832 = dma.done.wait (!%p744_p2), %s529_s9, 128  }
 0x33c   : > { %834 = vsyncadd (!%p744_p2), %s529_s9, 4294967168  ;;  %p17_p3 = scmp.ge.s32.totalorder %s920_s30, 4   ;;  %s1129_s24 = smov %s841_s25 }
 0x33d   : > { %s1130_s25 = smov %s845_s26  ;;  %s1131_s26 = smov %s931_s10 }
 0x33e   : > { %s1132_s27 = smov %s920_s30  ;;  %19 = sbr.rel (!%p17_p3) target bundleno = 3 (0x3), region = 83 }
 0x345   :  { %534 = vsyncpa [#allocation3], 1 }
 0x346   :  { %536 = vsyncpa [#allocation3 + $0x1], 1 }

</bundles_post_ra>
